<compile_context>
chip_gen: v5e
topology: v5e:2x2
jax: 0.10.0
libtpu: 0.0.40
codegen_flags: <defaults>
</compile_context>

<pallas_src>
import jax
import jax.numpy as jnp
from jax.experimental import pallas as pl
from jax.experimental.pallas import tpu as pltpu

FEATURE_D = 1280
FEATURE_H = 3
FEATURE_W = 3
FEATURE_EXTRACTOR_SIZE = FEATURE_D * FEATURE_H * FEATURE_W  # 11520
STARTING_SOFTMAX_NEURONS = 40


def _linear_kernel(x_ref, wq_ref, scale_ref, b_ref, o_ref):
    """One B-tile of   out = (x @ dequant(Wq)^T) + b.

    x_ref:     (TB, K) activations, bf16 (or f32; cast below is a no-op for bf16)
    wq_ref:    (N, K)  int8 weight, torch Linear layout (lane-dense rows)
    scale_ref: (1, N)  per-output-channel dequant scale, f32
    b_ref:     (1, N)  bias, f32
    o_ref:     (TB, N) output, f32
    """
    x = x_ref[...].astype(jnp.bfloat16)                       # (TB, K)
    w = wq_ref[...].astype(jnp.bfloat16)                      # (N, K); int8->bf16 exact
    acc = jax.lax.dot_general(
        x, w,
        dimension_numbers=(((1,), (1,)), ((), ())),           # contract K on both
        preferred_element_type=jnp.float32,                   # f32 accumulation
    )                                                         # (TB, N) f32
    o_ref[...] = (acc * scale_ref[...] + b_ref[...]).astype(o_ref.dtype)


def prepare_params(weight, bias):
    """One-time (offline / parameter-load-time) prep, kept OUT of the hot path.

    weight: (40, 11520) f32 (torch nn.Linear convention: out x in)
    bias:   (40,)       f32
    returns (w_q int8 (40, 11520), scale f32 (1, 40), bias f32 (1, 40))
    """
    n = STARTING_SOFTMAX_NEURONS
    absmax = jnp.max(jnp.abs(weight), axis=1, keepdims=True)           # (N, 1)
    scale = jnp.maximum(absmax, 1e-30) / 127.0
    w_q = jnp.clip(jnp.round(weight / scale), -127, 127).astype(jnp.int8)
    scale_2d = scale.reshape(1, n).astype(jnp.float32)
    bias_2d = bias.reshape(1, n).astype(jnp.float32)
    return w_q, scale_2d, bias_2d


def _pick_tile_b(batch, x_itemsize):
    # Keep double-buffered x (2 * TB * 11520 * itemsize) under ~12 MB so the
    # kernel fits even v5e's 16 MiB scoped-VMEM default with no extra flags.
    # (v6e/v7x could take larger tiles + vmem_limit_bytes; marginal past ~85%
    #  of HBM roofline, so we keep one portable setting.)
    tb = 256 if x_itemsize <= 2 else 128
    return batch if batch <= tb else tb


def edge_temp_classifier_forward(x, w_q, scale_2d, bias_2d):
    """Forward pass of EdgeTempClassifier (inference).

    x:        (B, 1280, 3, 3) bf16 preferred (f32 accepted), NCHW as in PyTorch
    w_q:      (40, 11520)     int8   (from prepare_params)
    scale_2d: (1, 40)         f32    (from prepare_params)
    bias_2d:  (1, 40)         f32    (from prepare_params)
    returns   (B, 40)         f32
    """
    xf = x.reshape(-1, FEATURE_EXTRACTOR_SIZE)   # matches torch x.view(-1, 11520)
    B = xf.shape[0]
    K = FEATURE_EXTRACTOR_SIZE
    N = STARTING_SOFTMAX_NEURONS

    TB = _pick_tile_b(B, xf.dtype.itemsize)
    grid = (pl.cdiv(B, TB),)

    cost = pl.CostEstimate(
        flops=2 * B * K * N,
        bytes_accessed=(K * N * 1                          # int8 weight stream
                        + B * K * xf.dtype.itemsize        # activations
                        + 2 * N * 4                        # scale + bias
                        + B * N * 4),                      # output
        transcendentals=0,
    )

    return pl.pallas_call(
        _linear_kernel,
        out_shape=jax.ShapeDtypeStruct((B, N), jnp.float32),
        grid_spec=pltpu.PrefetchScalarGridSpec(
            num_scalar_prefetch=0,
            grid=grid,
            in_specs=[
                pl.BlockSpec((TB, K), lambda i: (i, 0)),   # x: tiled over batch
                pl.BlockSpec((N, K), lambda i: (0, 0)),    # weight: resident across tiles
                pl.BlockSpec((1, N), lambda i: (0, 0)),    # scale: resident
                pl.BlockSpec((1, N), lambda i: (0, 0)),    # bias: resident
            ],
            out_specs=pl.BlockSpec((TB, N), lambda i: (i, 0)),
        ),
        compiler_params=pltpu.CompilerParams(
            dimension_semantics=("parallel",),             # v7x: 2 TCs split the batch
        ),
        cost_estimate=cost,
    )(xf, w_q, scale_2d, bias_2d)


if __name__ == "__main__":
    key = jax.random.PRNGKey(0)
    k_x, k_w, k_b = jax.random.split(key, 3)

    # Small batch; feature dims are fixed by the module definition.
    B = 2
    x_f32 = jax.random.normal(k_x, (B, FEATURE_D, FEATURE_H, FEATURE_W), jnp.float32)
    # Upstream feature extractor is expected to emit bf16 activations (cast once).
    x_bf16 = x_f32.astype(jnp.bfloat16)

    # Deterministic parameter init (PyTorch Linear-style uniform +-1/sqrt(fan_in)).
    bound = 1.0 / (FEATURE_EXTRACTOR_SIZE ** 0.5)
    weight = jax.random.uniform(
        k_w, (STARTING_SOFTMAX_NEURONS, FEATURE_EXTRACTOR_SIZE),
        jnp.float32, minval=-bound, maxval=bound)
    bias = jax.random.uniform(
        k_b, (STARTING_SOFTMAX_NEURONS,),
        jnp.float32, minval=-bound, maxval=bound)

    # One-time parameter prep (quantize weight to int8 + per-channel scale).
    w_q, scale_2d, bias_2d = prepare_params(weight, bias)

    out = edge_temp_classifier_forward(x_bf16, w_q, scale_2d, bias_2d)
    out = jax.block_until_ready(out)

    # Pure-JAX full-precision reference (torch semantics, eval-mode dropout).
    # Tolerance is loosened for the int8-weight / bf16-activation streams with
    # f32 accumulation (observed abs error ~5e-3 on O(1) logits).
    ref = jnp.dot(x_f32.reshape(-1, FEATURE_EXTRACTOR_SIZE), weight.T,
                  precision=jax.lax.Precision.HIGHEST) + bias
    assert out.shape == (B, STARTING_SOFTMAX_NEURONS)
    assert jnp.allclose(out, ref, atol=5e-2, rtol=5e-2), (
        "max abs err = %f" % float(jnp.max(jnp.abs(out - ref))))

    print("KERNEL_OK")
</pallas_src>

<mosaic_0001>
module attributes {stable_mosaic.version = 11 : i64} {
  func.func @_linear_kernel(%arg0: i32, %arg1: memref<2x11520xbf16, #tpu.memory_space<vmem>>, %arg2: memref<40x11520xi8, #tpu.memory_space<vmem>>, %arg3: memref<1x40xf32, #tpu.memory_space<vmem>>, %arg4: memref<1x40xf32, #tpu.memory_space<vmem>>, %arg5: memref<2x40xf32, #tpu.memory_space<vmem>>) attributes {dimension_semantics = [#tpu.dimension_semantics<parallel>], iteration_bounds = array<i64: 1>, scalar_prefetch = 0 : i64, scratch_operands = 0 : i64, tpu.core_type = #tpu.core_type<tc>, window_params = [{transform_indices = @transform_0, window_bounds = array<i64: 2, 11520>}, {pipeline_mode = #tpu.pipeline_mode<synchronous>, transform_indices = @transform_1, window_bounds = array<i64: 40, 11520>}, {pipeline_mode = #tpu.pipeline_mode<synchronous>, transform_indices = @transform_2, window_bounds = array<i64: 1, 40>}, {pipeline_mode = #tpu.pipeline_mode<synchronous>, transform_indices = @transform_3, window_bounds = array<i64: 1, 40>}, {transform_indices = @transform_4, window_bounds = array<i64: 2, 40>}]} {
    %c0 = arith.constant 0 : index
    %c0_0 = arith.constant 0 : index
    %0 = vector.load %arg1[%c0, %c0_0] : memref<2x11520xbf16, #tpu.memory_space<vmem>>, vector<2x11520xbf16>
    %c0_1 = arith.constant 0 : index
    %c0_2 = arith.constant 0 : index
    %1 = vector.load %arg2[%c0_1, %c0_2] : memref<40x11520xi8, #tpu.memory_space<vmem>>, vector<40x11520xi8>
    %2 = arith.sitofp %1 : vector<40x11520xi8> to vector<40x11520xbf16>
    %cst = arith.constant dense<0.000000e+00> : vector<2x40xf32>
    %3 = tpu.matmul %0, %2, %cst {dimension_numbers = #tpu.dot_dimension_numbers<[1], [1], [0], [0], [0, 0, 1, 0], [], []>} : vector<2x11520xbf16>, vector<40x11520xbf16>, vector<2x40xf32> -> vector<2x40xf32>
    %c0_3 = arith.constant 0 : index
    %c0_4 = arith.constant 0 : index
    %4 = vector.load %arg3[%c0_3, %c0_4] : memref<1x40xf32, #tpu.memory_space<vmem>>, vector<1x40xf32>
    %5 = vector.broadcast %4 : vector<1x40xf32> to vector<2x40xf32>
    %6 = arith.mulf %3, %5 : vector<2x40xf32>
    %c0_5 = arith.constant 0 : index
    %c0_6 = arith.constant 0 : index
    %7 = vector.load %arg4[%c0_5, %c0_6] : memref<1x40xf32, #tpu.memory_space<vmem>>, vector<1x40xf32>
    %8 = vector.broadcast %7 : vector<1x40xf32> to vector<2x40xf32>
    %9 = arith.addf %6, %8 : vector<2x40xf32>
    %c0_7 = arith.constant 0 : index
    %c0_8 = arith.constant 0 : index
    %10 = vector.load %arg5[%c0_7, %c0_8] : memref<2x40xf32, #tpu.memory_space<vmem>>, vector<2x40xf32>
    tpu.vector_store %arg5[%c0_7, %c0_8], %9 {strides = array<i32>} : memref<2x40xf32, #tpu.memory_space<vmem>>, vector<2x40xf32>,
    return
  }
  func.func @transform_0(%arg0: i32) -> (i32, i32) {
    %c0_i32 = arith.constant 0 : i32
    %c0_i32_0 = arith.constant 0 : i32
    return %arg0, %c0_i32 : i32, i32
  }
  func.func @transform_1(%arg0: i32) -> (i32, i32) {
    %c0_i32 = arith.constant 0 : i32
    %c0_i32_0 = arith.constant 0 : i32
    %c0_i32_1 = arith.constant 0 : i32
    return %c0_i32, %c0_i32_0 : i32, i32
  }
  func.func @transform_2(%arg0: i32) -> (i32, i32) {
    %c0_i32 = arith.constant 0 : i32
    %c0_i32_0 = arith.constant 0 : i32
    %c0_i32_1 = arith.constant 0 : i32
    return %c0_i32, %c0_i32_0 : i32, i32
  }
  func.func @transform_3(%arg0: i32) -> (i32, i32) {
    %c0_i32 = arith.constant 0 : i32
    %c0_i32_0 = arith.constant 0 : i32
    %c0_i32_1 = arith.constant 0 : i32
    return %c0_i32, %c0_i32_0 : i32, i32
  }
  func.func @transform_4(%arg0: i32) -> (i32, i32) {
    %c0_i32 = arith.constant 0 : i32
    %c0_i32_0 = arith.constant 0 : i32
    return %arg0, %c0_i32 : i32, i32
  }
}

</mosaic_0001>

<bundles_post_ra>
// kernel: tpu_custom_call.1
= control target key start
LH: loop header
LB: loop body
LE: loop exit
PB: predicated region body
PF: predicated region fallthrough
CT: control target
= control target key end

     0   :  { %9 = vsyncpa [#allocation3], 0  ;;  %s3012_s0 = inlined_call_operand.hbm [shape: bf16[2,11520], index: 0, kind: input, shape index: {}]   ;;  %s3013_s1 = inlined_call_operand.hbm [shape: s8[40,11520], index: 1, kind: input, shape index: {}]   ;;  %s3014_s2 = inlined_call_operand.vmem [shape: f32[1,40], index: 2, kind: input, shape index: {}]   ;;  %s3015_s3 = inlined_call_operand.vmem [shape: f32[1,40], index: 3, kind: input, shape index: {}]   ;;  %s3016_s4 = inlined_call_operand.hbm [shape: f32[2,40], index: 4, kind: output, shape index: {}]  }
   0x1   :  { %10 = vsyncpa [#allocation6], 0 }
   0x2   :  { %11 = vsyncpa [#allocation4], 0  ;;  %s17_s17 = sshll.u32 %s3012_s0, 4  ;;  %s2835_s18 = smov [#allocation2]   ;;  %s18_s17 = int_to_ptr.hbm [resolvable:$true] %s17_s17 }
   0x3   :  { %s19_s19 = sshll.u32 %s2835_s18, 4  ;;  %s27_s22 = sshll.u32 %s3013_s1, 4  ;;  %s20_s19 = int_to_ptr.vmem [resolvable:$true] %s19_s19  ;;  %s28_s22 = int_to_ptr.hbm [resolvable:$true] %s27_s22 }
   0x4   :  { %22 = dma.hbm_to_vmem [thread:$0]  %s18_s17, 1440, %s20_s19, [#allocation3]  }
   0x5   :  { %s2836_s23 = smov [#allocation5]   ;;  %s2837_s25 = smov 2880  }
   0x6   :  { %s29_s24 = sshll.u32 %s2836_s23, 4  ;;  %s2838_s26 = smov 180   ;;  %s30_s24 = int_to_ptr.vmem [resolvable:$true] %s29_s24 }
   0x7   :  { %35 = dma.hbm_to_vmem [thread:$0]  %s28_s22, 14400, %s30_s24, [#allocation6], %s2837_s25, %s2837_s25, %s2838_s26  }
   0x8   :  { %2829 = dma.done.wait [#allocation3], 1440  }
   0x9   :  { %2830 = vsyncadd [#allocation3], 4294965856 }
   0xa   :  { %2831 = dma.done.wait [#allocation6], 14400  }
   0xb   :  { %2832 = vsyncadd [#allocation6], 4294952896  ;;  %v153_v0 = vld [vmem:[#allocation5 + $0x2d0] sm:$0xff]  ;;  %v107_v1 = vld [vmem:[#allocation5 + $0x168] sm:$0xff]  ;;  %s2839_s29 = smov [#allocation7]   ;;  %s2739_s7 = sshll.u32 %s3016_s4, 4  ;;  %s2740_s7 = int_to_ptr.hbm [resolvable:$true] %s2739_s7 }
   0xc   :  { %v130_v2 = vld [vmem:[#allocation5 + $0x21c] sm:$0xff]  ;;  %v536_v3 = vunpack.c.0.s8 %v153_v0  ;;  %v537_v4 = vunpack.c.1.s8 %v153_v0  ;;  %v538_v5 = vunpack.c.2.s8 %v153_v0  ;;  %v539_v6 = vunpack.c.3.s8 %v153_v0  ;;  %v49_v11 = vld [vmem:[#allocation2] sm:$0xff]  ;;  %v84_v25 = vld [vmem:[#allocation5 + $0xb4] sm:$0xff]  ;;  %s2737_s30 = sshll.u32 %s2839_s29, 4  ;;  %s2738_s30 = int_to_ptr.vmem [resolvable:$true] %s2737_s30 }
   0xd   :  { %v356_v7 = vunpack.c.0.s8 %v107_v1  ;;  %v446_v8 = vunpack.c.0.s8 %v130_v2  ;;  %v357_v9 = vunpack.c.1.s8 %v107_v1  ;;  %v447_v10 = vunpack.c.1.s8 %v130_v2  ;;  %1347 = vst [vmem:[#allocation1] ss:$9 sm:$0xff] %v49_v11  ;;  %v61_v24 = vld [vmem:[#allocation5] sm:$0xff]  ;;  %v154_v36 = vld [vmem:[#allocation5 + $0x2d8] sm:$0xff]  ;;  %v108_v61 = vld [vmem:[#allocation5 + $0x170] sm:$0xff] }
   0xe   :  { %v986_v12 = vcvt.s32.f32 %v536_v3  ;;  %v987_v13 = vcvt.s32.f32 %v537_v4  ;;  %v988_v14 = vcvt.s32.f32 %v538_v5  ;;  %v989_v15 = vcvt.s32.f32 %v539_v6  ;;  %v131_v62 = vld [vmem:[#allocation5 + $0x224] sm:$0xff] }
   0xf   :  { %v806_v20 = vcvt.s32.f32 %v356_v7  ;;  %v896_v21 = vcvt.s32.f32 %v446_v8  ;;  %v358_v22 = vunpack.c.2.s8 %v107_v1  ;;  %v448_v23 = vunpack.c.2.s8 %v130_v2 }
  0x10   :  { %v1256_v16 = vpack.c.bf16 %v986_v12, %v986_v12  ;;  %v1257_v17 = vpack.c.bf16 %v987_v13, %v987_v13  ;;  %v1258_v18 = vpack.c.bf16 %v988_v14, %v988_v14  ;;  %v1259_v19 = vpack.c.bf16 %v989_v15, %v989_v15 }
  0x11   :  { %v807_v26 = vcvt.s32.f32 %v357_v9  ;;  %v897_v27 = vcvt.s32.f32 %v447_v10  ;;  %v359_v28 = vunpack.c.3.s8 %v107_v1  ;;  %v449_v29 = vunpack.c.3.s8 %v130_v2 }
  0x12   :  { %1555 = vmatpush.bf16.xpose.msra.mxu0 %v1256_v16  ;;  %1568 = vmatpush.bf16.xpose.msra.mxu1 %v1257_v17  ;;  %v808_v30 = vcvt.s32.f32 %v358_v22  ;;  %v898_v31 = vcvt.s32.f32 %v448_v23  ;;  %v176_v34 = vunpack.c.0.s8 %v61_v24  ;;  %v266_v35 = vunpack.c.0.s8 %v84_v25  ;;  %v85_v22 = vld [vmem:[#allocation5 + $0xbc] sm:$0xff] }
  0x13   :  { %1581 = vmatpush.bf16.xpose.msra.mxu2 %v1258_v18  ;;  %1594 = vmatpush.bf16.xpose.msra.mxu3 %v1259_v19  ;;  %v809_v32 = vcvt.s32.f32 %v359_v28  ;;  %v899_v33 = vcvt.s32.f32 %v449_v29  ;;  %v1166_v37 = vpack.c.bf16 %v896_v21, %v806_v20  ;;  %v177_v38 = vunpack.c.1.s8 %v61_v24  ;;  %v62_v21 = vld [vmem:[#allocation5 + $0x8] sm:$0xff] }
  0x14   :  { %v267_v39 = vunpack.c.1.s8 %v84_v25  ;;  %v1167_v40 = vpack.c.bf16 %v897_v27, %v807_v26  ;;  %v178_v41 = vunpack.c.2.s8 %v61_v24  ;;  %v268_v42 = vunpack.c.2.s8 %v84_v25  ;;  %v1348_v23 = vld [vmem:[#allocation1] sm:$0xff]  ;;  %v1349_v27 = vld [vmem:[#allocation1 + $0x9] sm:$0xff] }
  0x15   :  { %v179_v43 = vunpack.c.3.s8 %v61_v24  ;;  %v1168_v44 = vpack.c.bf16 %v898_v31, %v808_v30  ;;  %v1169_v45 = vpack.c.bf16 %v899_v33, %v809_v32  ;;  %v269_v46 = vunpack.c.3.s8 %v84_v25  ;;  %v1350_v24 = vld [vmem:[#allocation1 + $0x12] sm:$0xff]  ;;  %v1351_v30 = vld [vmem:[#allocation1 + $0x1b] sm:$0xff]  ;;  %v2871_v31 = vld [vmem:[#allocation1 + $0x24] sm:$0xff] }
  0x16   :  { %v540_v47 = vunpack.c.0.s8 %v154_v36  ;;  %v626_v48 = vcvt.s32.f32 %v176_v34  ;;  %v716_v49 = vcvt.s32.f32 %v266_v35  ;;  %v541_v50 = vunpack.c.1.s8 %v154_v36  ;;  %v2873_v32 = vld [vmem:[#allocation1 + $0x36] sm:$0xff]  ;;  %v2875_v33 = vld [vmem:[#allocation1 + $0x2d] sm:$0xff]  ;;  %v2877_v34 = vld [vmem:[#allocation1 + $0x3f] sm:$0xff] }
  0x17   :  { %v627_v51 = vcvt.s32.f32 %v177_v38  ;;  %v717_v52 = vcvt.s32.f32 %v267_v39  ;;  %v542_v53 = vunpack.c.2.s8 %v154_v36  ;;  %v543_v54 = vunpack.c.3.s8 %v154_v36  ;;  %v50_v35 = vld [vmem:[#allocation2 + $0x8] sm:$0xff] }
  0x18   :  { %v628_v55 = vcvt.s32.f32 %v178_v41  ;;  %v718_v56 = vcvt.s32.f32 %v268_v42  ;;  %v629_v57 = vcvt.s32.f32 %v179_v43  ;;  %v719_v58 = vcvt.s32.f32 %v269_v46  ;;  %1357 = vst [vmem:[#allocation1] ss:$9 sm:$0xff] %v50_v35 }
  0x19   :  { %v990_v59 = vcvt.s32.f32 %v540_v47  ;;  %v991_v60 = vcvt.s32.f32 %v541_v50  ;;  %v1076_v63 = vpack.c.bf16 %v716_v49, %v626_v48  ;;  %v1077_v0 = vpack.c.bf16 %v717_v52, %v627_v51 }
  0x1a   :  { %1556 = vmatpush.bf16.xpose.msra.mxu0 %v1166_v37  ;;  %1569 = vmatpush.bf16.xpose.msra.mxu1 %v1167_v40  ;;  %v992_v1 = vcvt.s32.f32 %v542_v53  ;;  %v993_v2 = vcvt.s32.f32 %v543_v54  ;;  %v1078_v3 = vpack.c.bf16 %v718_v56, %v628_v55  ;;  %v1079_v4 = vpack.c.bf16 %v719_v58, %v629_v57  ;;  %v155_v40 = vld [vmem:[#allocation5 + $0x2e0] sm:$0xff] }
  0x1b   :  { %1582 = vmatpush.bf16.xpose.msra.mxu2 %v1168_v44  ;;  %1595 = vmatpush.bf16.xpose.msra.mxu3 %v1169_v45  ;;  %v360_v5 = vunpack.c.0.s8 %v108_v61  ;;  %v450_v6 = vunpack.c.0.s8 %v131_v62  ;;  %v1260_v7 = vpack.c.bf16 %v990_v59, %v990_v59  ;;  %v1261_v8 = vpack.c.bf16 %v991_v60, %v991_v60 }
  0x1c   :  { %v361_v9 = vunpack.c.1.s8 %v108_v61  ;;  %v451_v10 = vunpack.c.1.s8 %v131_v62  ;;  %v362_v11 = vunpack.c.2.s8 %v108_v61  ;;  %v452_v12 = vunpack.c.2.s8 %v131_v62 }
  0x1d   :  { %v363_v13 = vunpack.c.3.s8 %v108_v61  ;;  %v453_v14 = vunpack.c.3.s8 %v131_v62  ;;  %v1262_v15 = vpack.c.bf16 %v992_v1, %v992_v1  ;;  %v1263_v16 = vpack.c.bf16 %v993_v2, %v993_v2  ;;  %v109_v61 = vld [vmem:[#allocation5 + $0x178] sm:$0xff]  ;;  %v132_v62 = vld [vmem:[#allocation5 + $0x22c] sm:$0xff] }
  0x1e   :  { %v810_v17 = vcvt.s32.f32 %v360_v5  ;;  %v900_v18 = vcvt.s32.f32 %v450_v6  ;;  %v811_v19 = vcvt.s32.f32 %v361_v9  ;;  %v901_v20 = vcvt.s32.f32 %v451_v10 }
  0x1f   :  { %v812_v25 = vcvt.s32.f32 %v362_v11  ;;  %v902_v26 = vcvt.s32.f32 %v452_v12  ;;  %v813_v28 = vcvt.s32.f32 %v363_v13  ;;  %v903_v29 = vcvt.s32.f32 %v453_v14 }
  0x20   :  { %v1170_v36 = vpack.c.bf16 %v900_v18, %v810_v17  ;;  %v180_v37 = vunpack.c.0.s8 %v62_v21  ;;  %v270_v38 = vunpack.c.0.s8 %v85_v22  ;;  %v181_v39 = vunpack.c.1.s8 %v62_v21 }
  0x21   :  { %v1171_v41 = vpack.c.bf16 %v901_v20, %v811_v19  ;;  %v1172_v42 = vpack.c.bf16 %v902_v26, %v812_v25  ;;  %v1173_v43 = vpack.c.bf16 %v903_v29, %v813_v28  ;;  %v271_v44 = vunpack.c.1.s8 %v85_v22 }
  0x22   :  { %1557 = vmatpush.bf16.xpose.msra.mxu0 %v1076_v63  ;;  %1570 = vmatpush.bf16.xpose.msra.mxu1 %v1077_v0  ;;  %v182_v45 = vunpack.c.2.s8 %v62_v21  ;;  %v272_v46 = vunpack.c.2.s8 %v85_v22  ;;  %v183_v47 = vunpack.c.3.s8 %v62_v21  ;;  %v273_v48 = vunpack.c.3.s8 %v85_v22 }
  0x23   :  { %1583 = vmatpush.bf16.xpose.msra.mxu2 %v1078_v3  ;;  %1596 = vmatpush.bf16.xpose.msra.mxu3 %v1079_v4  ;;  %v544_v49 = vunpack.c.0.s8 %v155_v40  ;;  %v545_v50 = vunpack.c.1.s8 %v155_v40  ;;  %v546_v51 = vunpack.c.2.s8 %v155_v40  ;;  %v547_v52 = vunpack.c.3.s8 %v155_v40 }
  0x24   :  { %v630_v53 = vcvt.s32.f32 %v180_v37  ;;  %v720_v54 = vcvt.s32.f32 %v270_v38  ;;  %v631_v55 = vcvt.s32.f32 %v181_v39  ;;  %v721_v56 = vcvt.s32.f32 %v271_v44  ;;  %v156_v39 = vld [vmem:[#allocation5 + $0x2e8] sm:$0xff] }
  0x25   :  { %v632_v57 = vcvt.s32.f32 %v182_v45  ;;  %v722_v58 = vcvt.s32.f32 %v272_v46  ;;  %v633_v59 = vcvt.s32.f32 %v183_v47  ;;  %v723_v60 = vcvt.s32.f32 %v273_v48 }
  0x26   :  { %v994_v63 = vcvt.s32.f32 %v544_v49  ;;  %v995_v0 = vcvt.s32.f32 %v545_v50  ;;  %v996_v1 = vcvt.s32.f32 %v546_v51  ;;  %v997_v2 = vcvt.s32.f32 %v547_v52 }
  0x27   :  { %v1080_v3 = vpack.c.bf16 %v720_v54, %v630_v53  ;;  %v1081_v4 = vpack.c.bf16 %v721_v56, %v631_v55  ;;  %v364_v5 = vunpack.c.0.s8 %v109_v61  ;;  %v454_v6 = vunpack.c.0.s8 %v132_v62 }
  0x28   :  { %v365_v9 = vunpack.c.1.s8 %v109_v61  ;;  %v455_v10 = vunpack.c.1.s8 %v132_v62  ;;  %v1264_v11 = vpack.c.bf16 %v994_v63, %v994_v63  ;;  %v1265_v12 = vpack.c.bf16 %v995_v0, %v995_v0 }
  0x29   :  { %1558 = vmatmul.bf16.vlgmr.msra.gmra.mxu0 %v1348_v23  ;;  %1571 = vmatmul.bf16.vlgmr.msra.gmra.mxu1 %v1349_v27  ;;  %v1266_v13 = vpack.c.bf16 %v996_v1, %v996_v1  ;;  %v1267_v14 = vpack.c.bf16 %v997_v2, %v997_v2  ;;  %v367_v17 = vunpack.c.3.s8 %v109_v61  ;;  %v457_v18 = vunpack.c.3.s8 %v132_v62  ;;  %v63_v23 = vld [vmem:[#allocation5 + $0x10] sm:$0xff] }
  0x2a   :  { %1607 = vmatpush.bf16.xpose.msrb.mxu0 %v1260_v7  ;;  %1620 = vmatpush.bf16.xpose.msrb.mxu1 %v1261_v8  ;;  %v1082_v7 = vpack.c.bf16 %v722_v58, %v632_v57  ;;  %v1083_v8 = vpack.c.bf16 %v723_v60, %v633_v59  ;;  %v814_v19 = vcvt.s32.f32 %v364_v5  ;;  %v904_v20 = vcvt.s32.f32 %v454_v6  ;;  %v110_v58 = vld [vmem:[#allocation5 + $0x180] sm:$0xff]  ;;  %v133_v59 = vld [vmem:[#allocation5 + $0x234] sm:$0xff] }
  0x2b   :  { %1633 = vmatpush.bf16.xpose.msrb.mxu2 %v1262_v15  ;;  %1646 = vmatpush.bf16.xpose.msrb.mxu3 %v1263_v16  ;;  %v366_v15 = vunpack.c.2.s8 %v109_v61  ;;  %v456_v16 = vunpack.c.2.s8 %v132_v62  ;;  %v815_v21 = vcvt.s32.f32 %v365_v9  ;;  %v905_v22 = vcvt.s32.f32 %v455_v10 }
  0x2c   :  { %1584 = vmatmul.bf16.vlgmr.msra.gmra.mxu2 %v1350_v24  ;;  %1597 = vmatmul.bf16.vlgmr.msra.gmra.mxu3 %v1351_v30  ;;  %v86_v24 = vld [vmem:[#allocation5 + $0xc4] sm:$0xff]  ;;  %v817_v27 = vcvt.s32.f32 %v367_v17  ;;  %v907_v28 = vcvt.s32.f32 %v457_v18  ;;  %v1174_v29 = vpack.c.bf16 %v904_v20, %v814_v19  ;;  %v184_v30 = vunpack.c.0.s8 %v63_v23  ;;  %v1360_v17 = vld [vmem:[#allocation1 + $0x12] sm:$0xff]  ;;  %v64_v19 = vld [vmem:[#allocation5 + $0x18] sm:$0xff] }
  0x2d   :  { %v816_v25 = vcvt.s32.f32 %v366_v15  ;;  %v906_v26 = vcvt.s32.f32 %v456_v16  ;;  %v1175_v35 = vpack.c.bf16 %v905_v22, %v815_v21  ;;  %v185_v37 = vunpack.c.1.s8 %v63_v23  ;;  %v1358_v16 = vld [vmem:[#allocation1] sm:$0xff]  ;;  %v1359_v18 = vld [vmem:[#allocation1 + $0x9] sm:$0xff] }
  0x2e   :  { %v275_v38 = vunpack.c.1.s8 %v86_v24  ;;  %v186_v40 = vunpack.c.2.s8 %v63_v23  ;;  %v1177_v45 = vpack.c.bf16 %v907_v28, %v817_v27  ;;  %v548_v46 = vunpack.c.0.s8 %v156_v39  ;;  %v87_v20 = vld [vmem:[#allocation5 + $0xcc] sm:$0xff]  ;;  %v1361_v21 = vld [vmem:[#allocation1 + $0x1b] sm:$0xff] }
  0x2f   :  { %v1176_v44 = vpack.c.bf16 %v906_v26, %v816_v25  ;;  %v549_v47 = vunpack.c.1.s8 %v156_v39  ;;  %v550_v48 = vunpack.c.2.s8 %v156_v39  ;;  %v551_v49 = vunpack.c.3.s8 %v156_v39  ;;  %v2883_v26 = vld [vmem:[#allocation1 + $0x24] sm:$0xff]  ;;  %v2885_v27 = vld [vmem:[#allocation1 + $0x36] sm:$0xff]  ;;  %v2887_v28 = vld [vmem:[#allocation1 + $0x2d] sm:$0xff] }
  0x30   :  { %v634_v50 = vcvt.s32.f32 %v184_v30  ;;  %v635_v52 = vcvt.s32.f32 %v185_v37  ;;  %v725_v53 = vcvt.s32.f32 %v275_v38  ;;  %v636_v54 = vcvt.s32.f32 %v186_v40  ;;  %v51_v30 = vld [vmem:[#allocation2 + $0x10] sm:$0xff] }
  0x31   :  { %v998_v56 = vcvt.s32.f32 %v548_v46  ;;  %v1000_v57 = vcvt.s32.f32 %v550_v48  ;;  %v368_v0 = vunpack.c.0.s8 %v110_v58  ;;  %v458_v1 = vunpack.c.0.s8 %v133_v59  ;;  %v157_v39 = vld [vmem:[#allocation5 + $0x2f0] sm:$0xff] }
  0x32   :  { %1608 = vmatpush.bf16.xpose.msrb.mxu0 %v1170_v36  ;;  %1621 = vmatpush.bf16.xpose.msrb.mxu1 %v1171_v41  ;;  %v274_v36 = vunpack.c.0.s8 %v86_v24  ;;  %v276_v41 = vunpack.c.2.s8 %v86_v24  ;;  %v1085_v61 = vpack.c.bf16 %v725_v53, %v635_v52  ;;  %v369_v2 = vunpack.c.1.s8 %v110_v58 }
  0x33   :  { %1634 = vmatpush.bf16.xpose.msrb.mxu2 %v1172_v42  ;;  %1647 = vmatpush.bf16.xpose.msrb.mxu3 %v1173_v43  ;;  %v187_v42 = vunpack.c.3.s8 %v63_v23  ;;  %v277_v43 = vunpack.c.3.s8 %v86_v24  ;;  %v1270_v6 = vpack.c.bf16 %v1000_v57, %v1000_v57  ;;  %v460_v9 = vunpack.c.2.s8 %v133_v59  ;;  %v111_v57 = vld [vmem:[#allocation5 + $0x188] sm:$0xff] }
  0x34   :  { %v724_v51 = vcvt.s32.f32 %v274_v36  ;;  %v371_v10 = vunpack.c.3.s8 %v110_v58  ;;  %v188_v37 = vunpack.c.0.s8 %v64_v19  ;;  %v278_v38 = vunpack.c.0.s8 %v87_v20 }
  0x35   :  { %v637_v55 = vcvt.s32.f32 %v187_v42  ;;  %v910_v23 = vcvt.s32.f32 %v460_v9  ;;  %v189_v40 = vunpack.c.1.s8 %v64_v19  ;;  %v190_v42 = vunpack.c.2.s8 %v64_v19 }
  0x36   :  { %v1084_v60 = vpack.c.bf16 %v724_v51, %v634_v50  ;;  %v821_v24 = vcvt.s32.f32 %v371_v10  ;;  %v191_v46 = vunpack.c.3.s8 %v64_v19  ;;  %v552_v48 = vunpack.c.0.s8 %v157_v39  ;;  %v88_v19 = vld [vmem:[#allocation5 + $0xd4] sm:$0xff] }
  0x37   :  { %v554_v50 = vunpack.c.2.s8 %v157_v39  ;;  %v555_v51 = vunpack.c.3.s8 %v157_v39  ;;  %v638_v52 = vcvt.s32.f32 %v188_v37  ;;  %v728_v53 = vcvt.s32.f32 %v278_v38 }
  0x38   :  { %v374_v10 = vunpack.c.2.s8 %v111_v57  ;;  %vm2730_vm0 = vcmask 320512  }
  0x3a   :  { %1609 = vmatpush.bf16.xpose.msrb.mxu0 %v1080_v3  ;;  %1622 = vmatpush.bf16.xpose.msrb.mxu1 %v1081_v4  ;;  %v459_v3 = vunpack.c.1.s8 %v133_v59  ;;  %v1268_v4 = vpack.c.bf16 %v998_v56, %v998_v56  ;;  %v641_v56 = vcvt.s32.f32 %v191_v46 }
  0x3b   :  { %1635 = vmatpush.bf16.xpose.msrb.mxu2 %v1082_v7  ;;  %1648 = vmatpush.bf16.xpose.msrb.mxu3 %v1083_v8  ;;  %v370_v8 = vunpack.c.2.s8 %v110_v58 }
  0x3c   :  { %v909_v15 = vcvt.s32.f32 %v459_v3 }
  0x3d   :  { %v820_v22 = vcvt.s32.f32 %v370_v8 }
  0x41   :  { %1610 = vmatmul.bf16.vlgmr.msrb.gmra.mxu0 %v2871_v31  ;;  %1623 = vmatmul.bf16.vlgmr.msrb.gmra.mxu1 %v2875_v33  ;;  %v726_v31 = vcvt.s32.f32 %v276_v41  ;;  %v727_v33 = vcvt.s32.f32 %v277_v43  ;;  %v279_v41 = vunpack.c.1.s8 %v87_v20  ;;  %v280_v43 = vunpack.c.2.s8 %v87_v20 }
  0x42   :  { %1659 = vmatpush.bf16.xpose.msra.mxu0 %v1264_v11  ;;  %1672 = vmatpush.bf16.xpose.msra.mxu1 %v1265_v12  ;;  %v461_v11 = vunpack.c.3.s8 %v133_v59  ;;  %v818_v12 = vcvt.s32.f32 %v368_v0  ;;  %v1004_v59 = vcvt.s32.f32 %v554_v50 }
  0x43   :  { %1685 = vmatpush.bf16.xpose.msra.mxu2 %v1266_v13  ;;  %1698 = vmatpush.bf16.xpose.msra.mxu3 %v1267_v14  ;;  %v1086_v62 = vpack.c.bf16 %v726_v31, %v636_v54  ;;  %v1087_v63 = vpack.c.bf16 %v727_v33, %v637_v55  ;;  %v908_v13 = vcvt.s32.f32 %v458_v1  ;;  %v819_v14 = vcvt.s32.f32 %v369_v2 }
  0x44   :  { %1636 = vmatmul.bf16.vlgmr.msrb.gmra.mxu2 %v2873_v32  ;;  %1649 = vmatmul.bf16.vlgmr.msrb.gmra.mxu3 %v2877_v34  ;;  %v999_v32 = vcvt.s32.f32 %v549_v47  ;;  %v1001_v34 = vcvt.s32.f32 %v551_v49  ;;  %v911_v25 = vcvt.s32.f32 %v461_v11  ;;  %v281_v47 = vunpack.c.3.s8 %v87_v20 }
  0x45   :  { %v1179_v36 = vpack.c.bf16 %v909_v15, %v819_v14  ;;  %v553_v49 = vunpack.c.1.s8 %v157_v39  ;;  %v639_v54 = vcvt.s32.f32 %v189_v40  ;;  %v729_v31 = vcvt.s32.f32 %v279_v41 }
  0x46   :  { %v1269_v5 = vpack.c.bf16 %v999_v32, %v999_v32  ;;  %v1271_v7 = vpack.c.bf16 %v1001_v34, %v1001_v34  ;;  %v640_v55 = vcvt.s32.f32 %v190_v42  ;;  %v730_v33 = vcvt.s32.f32 %v280_v43 }
  0x47   :  { %v731_v32 = vcvt.s32.f32 %v281_v47  ;;  %v1002_v34 = vcvt.s32.f32 %v552_v48  ;;  %v1003_v58 = vcvt.s32.f32 %v553_v49  ;;  %v372_v1 = vunpack.c.0.s8 %v111_v57 }
  0x48   :  { %v1090_v0 = vpack.c.bf16 %v730_v33, %v640_v55  ;;  %v1274_v8 = vpack.c.bf16 %v1004_v59, %v1004_v59  ;;  %v824_v20 = vcvt.s32.f32 %v374_v10  ;;  %v284_v40 = vunpack.c.2.s8 %v88_v19  ;;  %v112_v33 = vld [vmem:[#allocation5 + $0x190] sm:$0xff] }
  0x49   :  { %v1091_v2 = vpack.c.bf16 %v731_v32, %v641_v56  ;;  %v822_v14 = vcvt.s32.f32 %v372_v1  ;;  %v285_v42 = vunpack.c.3.s8 %v88_v19  ;;  %v378_v1 = vunpack.c.2.s8 %v112_v33 }
  0x4a   :  { %1660 = vmatpush.bf16.xpose.msra.mxu0 %v1174_v29  ;;  %1673 = vmatpush.bf16.xpose.msra.mxu1 %v1175_v35  ;;  %v2889_v29 = vld [vmem:[#allocation1 + $0x3f] sm:$0xff]  ;;  %v1178_v35 = vpack.c.bf16 %v908_v13, %v818_v12  ;;  %v375_v12 = vunpack.c.3.s8 %v111_v57 }
  0x4b   :  { %1686 = vmatpush.bf16.xpose.msra.mxu2 %v1176_v44  ;;  %1699 = vmatpush.bf16.xpose.msra.mxu3 %v1177_v45  ;;  %1367 = vst [vmem:[#allocation1] ss:$9 sm:$0xff] %v51_v30  ;;  %v1180_v44 = vpack.c.bf16 %v910_v23, %v820_v22  ;;  %v1181_v45 = vpack.c.bf16 %v911_v25, %v821_v24  ;;  %v158_v24 = vld [vmem:[#allocation5 + $0x2f8] sm:$0xff]  ;;  %v282_v30 = vunpack.c.0.s8 %v88_v19 }
  0x4c   :  { %v825_v22 = vcvt.s32.f32 %v375_v12  ;;  %v556_v43 = vunpack.c.0.s8 %v158_v24 }
  0x4d   :  { %v732_v48 = vcvt.s32.f32 %v282_v30 }
  0x4e   :  { %v1006_v55 = vcvt.s32.f32 %v556_v43 }
  0x50   :  { %v1276_v59 = vpack.c.bf16 %v1006_v55, %v1006_v55 }
  0x52   :  { %1661 = vmatpush.bf16.xpose.msra.mxu0 %v1084_v60  ;;  %1674 = vmatpush.bf16.xpose.msra.mxu1 %v1085_v61  ;;  %v1005_v60 = vcvt.s32.f32 %v555_v51  ;;  %v134_v61 = vld [vmem:[#allocation5 + $0x23c] sm:$0xff]  ;;  %v1370_v12 = vld [vmem:[#allocation1 + $0x12] sm:$0xff] }
  0x53   :  { %1687 = vmatpush.bf16.xpose.msra.mxu2 %v1086_v62  ;;  %1700 = vmatpush.bf16.xpose.msra.mxu3 %v1087_v63  ;;  %v1088_v62 = vpack.c.bf16 %v728_v53, %v638_v52  ;;  %v1089_v63 = vpack.c.bf16 %v729_v31, %v639_v54  ;;  %v462_v3 = vunpack.c.0.s8 %v134_v61  ;;  %v464_v11 = vunpack.c.2.s8 %v134_v61 }
  0x54   :  { %v1275_v9 = vpack.c.bf16 %v1005_v60, %v1005_v60  ;;  %v465_v13 = vunpack.c.3.s8 %v134_v61  ;;  %v734_v52 = vcvt.s32.f32 %v284_v40  ;;  %v558_v53 = vunpack.c.2.s8 %v158_v24 }
  0x55   :  { %v912_v15 = vcvt.s32.f32 %v462_v3  ;;  %v559_v54 = vunpack.c.3.s8 %v158_v24  ;;  %v379_v3 = vunpack.c.3.s8 %v112_v33 }
  0x56   :  { %v915_v23 = vcvt.s32.f32 %v465_v13  ;;  %v1008_v32 = vcvt.s32.f32 %v558_v53  ;;  %v1369_v13 = vld [vmem:[#allocation1 + $0x9] sm:$0xff] }
  0x57   :  { %v1182_v37 = vpack.c.bf16 %v912_v15, %v822_v14  ;;  %v828_v14 = vcvt.s32.f32 %v378_v1 }
  0x58   :  { %v1185_v46 = vpack.c.bf16 %v915_v23, %v825_v22  ;;  %v2897_v22 = vld [vmem:[#allocation1 + $0x36] sm:$0xff]  ;;  %v2899_v23 = vld [vmem:[#allocation1 + $0x2d] sm:$0xff] }
  0x59   :  { %1662 = vmatmul.bf16.vlgmr.msra.gmra.mxu0 %v1358_v16  ;;  %1675 = vmatmul.bf16.vlgmr.msra.gmra.mxu1 %v1359_v18  ;;  %v65_v18 = vld [vmem:[#allocation5 + $0x20] sm:$0xff] }
  0x5a   :  { %1711 = vmatpush.bf16.xpose.msrb.mxu0 %v1268_v4  ;;  %1724 = vmatpush.bf16.xpose.msrb.mxu1 %v1269_v5  ;;  %v373_v4 = vunpack.c.1.s8 %v111_v57  ;;  %v463_v5 = vunpack.c.1.s8 %v134_v61  ;;  %v192_v25 = vunpack.c.0.s8 %v65_v18  ;;  %v194_v39 = vunpack.c.2.s8 %v65_v18 }
  0x5b   :  { %1737 = vmatpush.bf16.xpose.msrb.mxu2 %v1270_v6  ;;  %1750 = vmatpush.bf16.xpose.msrb.mxu3 %v1271_v7  ;;  %v1272_v6 = vpack.c.bf16 %v1002_v34, %v1002_v34  ;;  %v1273_v7 = vpack.c.bf16 %v1003_v58, %v1003_v58  ;;  %v195_v41 = vunpack.c.3.s8 %v65_v18  ;;  %v1009_v57 = vcvt.s32.f32 %v559_v54 }
  0x5c   :  { %1688 = vmatmul.bf16.vlgmr.msra.gmra.mxu2 %v1360_v17  ;;  %1701 = vmatmul.bf16.vlgmr.msra.gmra.mxu3 %v1361_v21  ;;  %v823_v16 = vcvt.s32.f32 %v373_v4  ;;  %v913_v17 = vcvt.s32.f32 %v463_v5  ;;  %v914_v21 = vcvt.s32.f32 %v464_v11  ;;  %v642_v47 = vcvt.s32.f32 %v192_v25  ;;  %v1368_v11 = vld [vmem:[#allocation1] sm:$0xff] }
  0x5d   :  { %v644_v51 = vcvt.s32.f32 %v194_v39  ;;  %v645_v31 = vcvt.s32.f32 %v195_v41  ;;  %v376_v61 = vunpack.c.0.s8 %v112_v33  ;;  %v1278_v5 = vpack.c.bf16 %v1008_v32, %v1008_v32  ;;  %v52_v25 = vld [vmem:[#allocation2 + $0x18] sm:$0xff] }
  0x5e   :  { %v1183_v38 = vpack.c.bf16 %v913_v17, %v823_v16  ;;  %v1092_v56 = vpack.c.bf16 %v732_v48, %v642_v47  ;;  %v829_v16 = vcvt.s32.f32 %v379_v3 }
  0x5f   :  { %v1094_v34 = vpack.c.bf16 %v734_v52, %v644_v51 }
  0x62   :  { %1712 = vmatpush.bf16.xpose.msrb.mxu0 %v1178_v35  ;;  %1725 = vmatpush.bf16.xpose.msrb.mxu1 %v1179_v36  ;;  %v193_v35 = vunpack.c.1.s8 %v65_v18  ;;  %v283_v36 = vunpack.c.1.s8 %v88_v19  ;;  %v66_v18 = vld [vmem:[#allocation5 + $0x28] sm:$0xff]  ;;  %v89_v19 = vld [vmem:[#allocation5 + $0xdc] sm:$0xff] }
  0x63   :  { %1738 = vmatpush.bf16.xpose.msrb.mxu2 %v1180_v44  ;;  %1751 = vmatpush.bf16.xpose.msrb.mxu3 %v1181_v45  ;;  %v557_v44 = vunpack.c.1.s8 %v158_v24  ;;  %v1184_v45 = vpack.c.bf16 %v914_v21, %v824_v20  ;;  %v1371_v20 = vld [vmem:[#allocation1 + $0x1b] sm:$0xff]  ;;  %v2895_v21 = vld [vmem:[#allocation1 + $0x24] sm:$0xff]  ;;  %v196_v30 = vunpack.c.0.s8 %v66_v18  ;;  %v198_v43 = vunpack.c.2.s8 %v66_v18 }
  0x64   :  { %v643_v49 = vcvt.s32.f32 %v193_v35  ;;  %v733_v50 = vcvt.s32.f32 %v283_v36  ;;  %v2901_v24 = vld [vmem:[#allocation1 + $0x3f] sm:$0xff]  ;;  %v286_v35 = vunpack.c.0.s8 %v89_v19  ;;  %v197_v36 = vunpack.c.1.s8 %v66_v18 }
  0x65   :  { %1377 = vst [vmem:[#allocation1] ss:$9 sm:$0xff] %v52_v25  ;;  %v646_v51 = vcvt.s32.f32 %v196_v30 }
  0x66   :  { %v736_v52 = vcvt.s32.f32 %v286_v35  ;;  %v647_v53 = vcvt.s32.f32 %v197_v36 }
  0x6a   :  { %1713 = vmatpush.bf16.xpose.msrb.mxu0 %v1088_v62  ;;  %1726 = vmatpush.bf16.xpose.msrb.mxu1 %v1089_v63  ;;  %v377_v63 = vunpack.c.1.s8 %v112_v33  ;;  %v113_v33 = vld [vmem:[#allocation5 + $0x198] sm:$0xff] }
  0x6b   :  { %1739 = vmatpush.bf16.xpose.msrb.mxu2 %v1090_v0  ;;  %1752 = vmatpush.bf16.xpose.msrb.mxu3 %v1091_v2 }
  0x71   :  { %1714 = vmatmul.bf16.vlgmr.msrb.gmra.mxu0 %v2883_v26  ;;  %1727 = vmatmul.bf16.vlgmr.msrb.gmra.mxu1 %v2887_v28  ;;  %v735_v26 = vcvt.s32.f32 %v285_v42  ;;  %v1007_v28 = vcvt.s32.f32 %v557_v44  ;;  %v288_v44 = vunpack.c.2.s8 %v89_v19 }
  0x72   :  { %1763 = vmatpush.bf16.xpose.msra.mxu0 %v1272_v6  ;;  %1776 = vmatpush.bf16.xpose.msra.mxu1 %v1273_v7  ;;  %v1279_v6 = vpack.c.bf16 %v1009_v57, %v1009_v57  ;;  %v826_v7 = vcvt.s32.f32 %v376_v61  ;;  %v381_v61 = vunpack.c.1.s8 %v113_v33 }
  0x73   :  { %1789 = vmatpush.bf16.xpose.msra.mxu2 %v1274_v8  ;;  %1802 = vmatpush.bf16.xpose.msra.mxu3 %v1275_v9  ;;  %v1095_v58 = vpack.c.bf16 %v735_v26, %v645_v31  ;;  %v1277_v60 = vpack.c.bf16 %v1007_v28, %v1007_v28  ;;  %v827_v9 = vcvt.s32.f32 %v377_v63  ;;  %v648_v31 = vcvt.s32.f32 %v198_v43 }
  0x74   :  { %1740 = vmatmul.bf16.vlgmr.msrb.gmra.mxu2 %v2885_v27  ;;  %1753 = vmatmul.bf16.vlgmr.msrb.gmra.mxu3 %v2889_v29  ;;  %v135_v27 = vld [vmem:[#allocation5 + $0x244] sm:$0xff]  ;;  %v1093_v29 = vpack.c.bf16 %v733_v50, %v643_v49  ;;  %v738_v26 = vcvt.s32.f32 %v288_v44 }
  0x75   :  { %v466_v62 = vunpack.c.0.s8 %v135_v27  ;;  %v467_v0 = vunpack.c.1.s8 %v135_v27  ;;  %v468_v2 = vunpack.c.2.s8 %v135_v27  ;;  %v469_v4 = vunpack.c.3.s8 %v135_v27  ;;  %v136_v27 = vld [vmem:[#allocation5 + $0x24c] sm:$0xff] }
  0x76   :  { %v1098_v63 = vpack.c.bf16 %v738_v26, %v648_v31  ;;  %v114_v26 = vld [vmem:[#allocation5 + $0x1a0] sm:$0xff] }
  0x77   :  { %v916_v8 = vcvt.s32.f32 %v466_v62  ;;  %v917_v10 = vcvt.s32.f32 %v467_v0  ;;  %v918_v15 = vcvt.s32.f32 %v468_v2  ;;  %v919_v17 = vcvt.s32.f32 %v469_v4 }
  0x78   :  { %v471_v62 = vunpack.c.1.s8 %v136_v27 }
  0x79   :  { %v1186_v39 = vpack.c.bf16 %v916_v8, %v826_v7  ;;  %v1187_v40 = vpack.c.bf16 %v917_v10, %v827_v9  ;;  %v1188_v41 = vpack.c.bf16 %v918_v15, %v828_v14  ;;  %v1189_v42 = vpack.c.bf16 %v919_v17, %v829_v16  ;;  %v90_v14 = vld [vmem:[#allocation5 + $0xe4] sm:$0xff] }
  0x7a   :  { %1764 = vmatpush.bf16.xpose.msra.mxu0 %v1182_v37  ;;  %1777 = vmatpush.bf16.xpose.msra.mxu1 %v1183_v38  ;;  %v287_v37 = vunpack.c.1.s8 %v89_v19  ;;  %v159_v38 = vld [vmem:[#allocation5 + $0x300] sm:$0xff]  ;;  %v383_v7 = vunpack.c.3.s8 %v113_v33  ;;  %v473_v8 = vunpack.c.3.s8 %v136_v27  ;;  %v290_v30 = vunpack.c.0.s8 %v90_v14 }
  0x7b   :  { %1790 = vmatpush.bf16.xpose.msra.mxu2 %v1184_v45  ;;  %1803 = vmatpush.bf16.xpose.msra.mxu3 %v1185_v46  ;;  %v199_v45 = vunpack.c.3.s8 %v66_v18  ;;  %v289_v46 = vunpack.c.3.s8 %v89_v19  ;;  %v560_v47 = vunpack.c.0.s8 %v159_v38  ;;  %v561_v48 = vunpack.c.1.s8 %v159_v38 }
  0x7c   :  { %v562_v49 = vunpack.c.2.s8 %v159_v38  ;;  %v563_v50 = vunpack.c.3.s8 %v159_v38  ;;  %v737_v54 = vcvt.s32.f32 %v287_v37  ;;  %v833_v17 = vcvt.s32.f32 %v383_v7  ;;  %v160_v37 = vld [vmem:[#allocation5 + $0x308] sm:$0xff] }
  0x7d   :  { %v649_v55 = vcvt.s32.f32 %v199_v45  ;;  %v739_v28 = vcvt.s32.f32 %v289_v46  ;;  %v923_v18 = vcvt.s32.f32 %v473_v8  ;;  %v291_v36 = vunpack.c.1.s8 %v90_v14  ;;  %v91_v7 = vld [vmem:[#allocation5 + $0xec] sm:$0xff]  ;;  %v1378_v8 = vld [vmem:[#allocation1] sm:$0xff] }
  0x7e   :  { %v1012_v32 = vcvt.s32.f32 %v562_v49  ;;  %v1013_v57 = vcvt.s32.f32 %v563_v50  ;;  %v564_v44 = vunpack.c.0.s8 %v160_v37  ;;  %v565_v45 = vunpack.c.1.s8 %v160_v37 }
  0x7f   :  { %v1099_v0 = vpack.c.bf16 %v739_v28, %v649_v55  ;;  %v1193_v43 = vpack.c.bf16 %v923_v18, %v833_v17  ;;  %v566_v46 = vunpack.c.2.s8 %v160_v37  ;;  %v740_v49 = vcvt.s32.f32 %v290_v30  ;;  %v137_v55 = vld [vmem:[#allocation5 + $0x254] sm:$0xff]  ;;  %v2907_v17 = vld [vmem:[#allocation1 + $0x24] sm:$0xff] }
  0x80   :  { %v1282_v3 = vpack.c.bf16 %v1012_v32, %v1012_v32  ;;  %v1283_v4 = vpack.c.bf16 %v1013_v57, %v1013_v57  ;;  %v474_v32 = vunpack.c.0.s8 %v137_v55  ;;  %v385_v57 = vunpack.c.1.s8 %v114_v26  ;;  %v2909_v18 = vld [vmem:[#allocation1 + $0x36] sm:$0xff]  ;;  %v2913_v30 = vld [vmem:[#allocation1 + $0x3f] sm:$0xff] }
  0x81   :  { %v1016_v31 = vcvt.s32.f32 %v566_v46 }
  0x82   :  { %1765 = vmatpush.bf16.xpose.msra.mxu0 %v1092_v56  ;;  %1778 = vmatpush.bf16.xpose.msra.mxu1 %v1093_v29  ;;  %v1010_v56 = vcvt.s32.f32 %v560_v47  ;;  %v1011_v29 = vcvt.s32.f32 %v561_v48  ;;  %v567_v47 = vunpack.c.3.s8 %v160_v37 }
  0x83   :  { %1791 = vmatpush.bf16.xpose.msra.mxu2 %v1094_v34  ;;  %1804 = vmatpush.bf16.xpose.msra.mxu3 %v1095_v58  ;;  %v1096_v34 = vpack.c.bf16 %v736_v52, %v646_v51  ;;  %v1097_v58 = vpack.c.bf16 %v737_v54, %v647_v53  ;;  %v741_v51 = vcvt.s32.f32 %v291_v36  ;;  %v1014_v54 = vcvt.s32.f32 %v564_v44 }
  0x84   :  { %v1280_v1 = vpack.c.bf16 %v1010_v56, %v1010_v56  ;;  %v1281_v2 = vpack.c.bf16 %v1011_v29, %v1011_v29  ;;  %v384_v29 = vunpack.c.0.s8 %v114_v26 }
  0x89   :  { %1766 = vmatmul.bf16.vlgmr.msra.gmra.mxu0 %v1368_v11  ;;  %1779 = vmatmul.bf16.vlgmr.msra.gmra.mxu1 %v1369_v13  ;;  %v831_v11 = vcvt.s32.f32 %v381_v61  ;;  %v67_v13 = vld [vmem:[#allocation5 + $0x30] sm:$0xff] }
  0x8a   :  { %1815 = vmatpush.bf16.xpose.msrb.mxu0 %v1276_v59  ;;  %1828 = vmatpush.bf16.xpose.msrb.mxu1 %v1277_v60  ;;  %v380_v59 = vunpack.c.0.s8 %v113_v33  ;;  %v470_v60 = vunpack.c.0.s8 %v136_v27  ;;  %v200_v25 = vunpack.c.0.s8 %v67_v13  ;;  %v201_v35 = vunpack.c.1.s8 %v67_v13 }
  0x8b   :  { %1841 = vmatpush.bf16.xpose.msrb.mxu2 %v1278_v5  ;;  %1854 = vmatpush.bf16.xpose.msrb.mxu3 %v1279_v6  ;;  %v382_v5 = vunpack.c.2.s8 %v113_v33  ;;  %v472_v6 = vunpack.c.2.s8 %v136_v27  ;;  %v202_v38 = vunpack.c.2.s8 %v67_v13 }
  0x8c   :  { %1792 = vmatmul.bf16.vlgmr.msra.gmra.mxu2 %v1370_v12  ;;  %1805 = vmatmul.bf16.vlgmr.msra.gmra.mxu3 %v1371_v20  ;;  %v830_v9 = vcvt.s32.f32 %v380_v59  ;;  %v920_v10 = vcvt.s32.f32 %v470_v60  ;;  %v921_v12 = vcvt.s32.f32 %v471_v62  ;;  %v650_v48 = vcvt.s32.f32 %v200_v25  ;;  %v2911_v25 = vld [vmem:[#allocation1 + $0x2d] sm:$0xff] }
  0x8d   :  { %v832_v15 = vcvt.s32.f32 %v382_v5  ;;  %v922_v16 = vcvt.s32.f32 %v472_v6  ;;  %v651_v50 = vcvt.s32.f32 %v201_v35  ;;  %v652_v52 = vcvt.s32.f32 %v202_v38  ;;  %v68_v6 = vld [vmem:[#allocation5 + $0x38] sm:$0xff]  ;;  %v53_v35 = vld [vmem:[#allocation2 + $0x20] sm:$0xff] }
  0x8e   :  { %v1190_v19 = vpack.c.bf16 %v920_v10, %v830_v9  ;;  %v1191_v20 = vpack.c.bf16 %v921_v12, %v831_v11  ;;  %v1100_v28 = vpack.c.bf16 %v740_v49, %v650_v48  ;;  %v1286_v60 = vpack.c.bf16 %v1016_v31, %v1016_v31  ;;  %v1380_v9 = vld [vmem:[#allocation1 + $0x12] sm:$0xff]  ;;  %v1379_v10 = vld [vmem:[#allocation1 + $0x9] sm:$0xff]  ;;  %v1381_v11 = vld [vmem:[#allocation1 + $0x1b] sm:$0xff] }
  0x8f   :  { %v1101_v33 = vpack.c.bf16 %v741_v51, %v651_v50  ;;  %v386_v62 = vunpack.c.2.s8 %v114_v26  ;;  %v205_v38 = vunpack.c.1.s8 %v68_v6  ;;  %1387 = vst [vmem:[#allocation1] ss:$9 sm:$0xff] %v53_v35 }
  0x91   :  { %v836_v12 = vcvt.s32.f32 %v386_v62  ;;  %v655_v50 = vcvt.s32.f32 %v205_v38 }
  0x92   :  { %1816 = vmatpush.bf16.xpose.msrb.mxu0 %v1186_v39  ;;  %1829 = vmatpush.bf16.xpose.msrb.mxu1 %v1187_v40  ;;  %v292_v39 = vunpack.c.2.s8 %v90_v14  ;;  %v203_v40 = vunpack.c.3.s8 %v67_v13 }
  0x93   :  { %1842 = vmatpush.bf16.xpose.msrb.mxu2 %v1188_v41  ;;  %1855 = vmatpush.bf16.xpose.msrb.mxu3 %v1189_v42  ;;  %v293_v41 = vunpack.c.3.s8 %v90_v14  ;;  %v1192_v42 = vpack.c.bf16 %v922_v16, %v832_v15  ;;  %v161_v16 = vld [vmem:[#allocation5 + $0x310] sm:$0xff] }
  0x94   :  { %v653_v53 = vcvt.s32.f32 %v203_v40  ;;  %v206_v40 = vunpack.c.2.s8 %v68_v6  ;;  %v568_v46 = vunpack.c.0.s8 %v161_v16 }
  0x96   :  { %v1018_v31 = vcvt.s32.f32 %v568_v46 }
  0x9a   :  { %1817 = vmatpush.bf16.xpose.msrb.mxu0 %v1096_v34  ;;  %1830 = vmatpush.bf16.xpose.msrb.mxu1 %v1097_v58  ;;  %v475_v34 = vunpack.c.1.s8 %v137_v55  ;;  %v1284_v58 = vpack.c.bf16 %v1014_v54, %v1014_v54 }
  0x9b   :  { %1843 = vmatpush.bf16.xpose.msrb.mxu2 %v1098_v63  ;;  %1856 = vmatpush.bf16.xpose.msrb.mxu3 %v1099_v0  ;;  %v476_v63 = vunpack.c.2.s8 %v137_v55  ;;  %v387_v0 = vunpack.c.3.s8 %v114_v26  ;;  %v115_v26 = vld [vmem:[#allocation5 + $0x1a8] sm:$0xff] }
  0x9c   :  { %v925_v5 = vcvt.s32.f32 %v475_v34  ;;  %v390_v62 = vunpack.c.2.s8 %v115_v26 }
  0x9d   :  { %v926_v13 = vcvt.s32.f32 %v476_v63  ;;  %v837_v14 = vcvt.s32.f32 %v387_v0 }
  0x9f   :  { %v1196_v44 = vpack.c.bf16 %v926_v13, %v836_v12 }
  0xa1   :  { %1818 = vmatmul.bf16.vlgmr.msrb.gmra.mxu0 %v2895_v21  ;;  %1831 = vmatmul.bf16.vlgmr.msrb.gmra.mxu1 %v2899_v23  ;;  %v742_v21 = vcvt.s32.f32 %v292_v39  ;;  %v743_v23 = vcvt.s32.f32 %v293_v41  ;;  %v295_v39 = vunpack.c.1.s8 %v91_v7  ;;  %v296_v41 = vunpack.c.2.s8 %v91_v7 }
  0xa2   :  { %1867 = vmatpush.bf16.xpose.msra.mxu0 %v1280_v1  ;;  %1880 = vmatpush.bf16.xpose.msra.mxu1 %v1281_v2  ;;  %v477_v1 = vunpack.c.3.s8 %v137_v55  ;;  %v834_v2 = vcvt.s32.f32 %v384_v29  ;;  %v138_v55 = vld [vmem:[#allocation5 + $0x25c] sm:$0xff] }
  0xa3   :  { %1893 = vmatpush.bf16.xpose.msra.mxu2 %v1282_v3  ;;  %1906 = vmatpush.bf16.xpose.msra.mxu3 %v1283_v4  ;;  %v1102_v27 = vpack.c.bf16 %v742_v21, %v652_v52  ;;  %v1103_v56 = vpack.c.bf16 %v743_v23, %v653_v53  ;;  %v924_v3 = vcvt.s32.f32 %v474_v32  ;;  %v835_v4 = vcvt.s32.f32 %v385_v57 }
  0xa4   :  { %1844 = vmatmul.bf16.vlgmr.msrb.gmra.mxu2 %v2897_v22  ;;  %1857 = vmatmul.bf16.vlgmr.msrb.gmra.mxu3 %v2901_v24  ;;  %v1015_v22 = vcvt.s32.f32 %v565_v45  ;;  %v1017_v24 = vcvt.s32.f32 %v567_v47  ;;  %v927_v15 = vcvt.s32.f32 %v477_v1  ;;  %v569_v47 = vunpack.c.1.s8 %v161_v16 }
  0xa5   :  { %v1194_v36 = vpack.c.bf16 %v924_v3, %v834_v2  ;;  %v1195_v37 = vpack.c.bf16 %v925_v5, %v835_v4  ;;  %v745_v51 = vcvt.s32.f32 %v295_v39  ;;  %v570_v52 = vunpack.c.2.s8 %v161_v16  ;;  %v69_v4 = vld [vmem:[#allocation5 + $0x40] sm:$0xff]  ;;  %v92_v5 = vld [vmem:[#allocation5 + $0xf4] sm:$0xff] }
  0xa6   :  { %v1285_v59 = vpack.c.bf16 %v1015_v22, %v1015_v22  ;;  %v1287_v61 = vpack.c.bf16 %v1017_v24, %v1017_v24  ;;  %v1197_v45 = vpack.c.bf16 %v927_v15, %v837_v14  ;;  %v571_v21 = vunpack.c.3.s8 %v161_v16  ;;  %v162_v16 = vld [vmem:[#allocation5 + $0x318] sm:$0xff] }
  0xa7   :  { %v656_v53 = vcvt.s32.f32 %v206_v40  ;;  %v746_v23 = vcvt.s32.f32 %v296_v41  ;;  %v1019_v24 = vcvt.s32.f32 %v569_v47  ;;  %v1288_v57 = vpack.c.bf16 %v1018_v31, %v1018_v31  ;;  %v116_v31 = vld [vmem:[#allocation5 + $0x1b0] sm:$0xff] }
  0xa8   :  { %v480_v63 = vunpack.c.2.s8 %v138_v55  ;;  %v391_v2 = vunpack.c.3.s8 %v115_v26  ;;  %v481_v3 = vunpack.c.3.s8 %v138_v55  ;;  %v208_v14 = vunpack.c.0.s8 %v69_v4 }
  0xa9   :  { %v1106_v29 = vpack.c.bf16 %v746_v23, %v656_v53  ;;  %v1289_v34 = vpack.c.bf16 %v1019_v24, %v1019_v24  ;;  %v298_v15 = vunpack.c.0.s8 %v92_v5  ;;  %v210_v35 = vunpack.c.2.s8 %v69_v4 }
  0xaa   :  { %1868 = vmatpush.bf16.xpose.msra.mxu0 %v1190_v19  ;;  %1881 = vmatpush.bf16.xpose.msra.mxu1 %v1191_v20  ;;  %v204_v19 = vunpack.c.0.s8 %v68_v6  ;;  %v294_v20 = vunpack.c.0.s8 %v91_v7  ;;  %v841_v12 = vcvt.s32.f32 %v391_v2  ;;  %v931_v13 = vcvt.s32.f32 %v481_v3 }
  0xab   :  { %1894 = vmatpush.bf16.xpose.msra.mxu2 %v1192_v42  ;;  %1907 = vmatpush.bf16.xpose.msra.mxu3 %v1193_v43  ;;  %v207_v42 = vunpack.c.3.s8 %v68_v6  ;;  %v297_v43 = vunpack.c.3.s8 %v91_v7  ;;  %v211_v38 = vunpack.c.3.s8 %v69_v4  ;;  %v301_v39 = vunpack.c.3.s8 %v92_v5 }
  0xac   :  { %v654_v48 = vcvt.s32.f32 %v204_v19  ;;  %v744_v49 = vcvt.s32.f32 %v294_v20  ;;  %v209_v19 = vunpack.c.1.s8 %v69_v4  ;;  %v299_v20 = vunpack.c.1.s8 %v92_v5 }
  0xad   :  { %v657_v54 = vcvt.s32.f32 %v207_v42  ;;  %v747_v22 = vcvt.s32.f32 %v297_v43  ;;  %v1559_v42 = vpop.f32.mrf.mxu0  ;;  %v1572_v43 = vpop.f32.mrf.mxu1  ;;  %v1201_v46 = vpack.c.bf16 %v931_v13, %v841_v12  ;;  %v661_v53 = vcvt.s32.f32 %v211_v38  ;;  %v1388_v12 = vld [vmem:[#allocation1] sm:$0xff]  ;;  %v1390_v13 = vld [vmem:[#allocation1 + $0x12] sm:$0xff] }
  0xae   :  { %v1573_v47 = vadd.f32 %v1572_v43, %v1559_v42  ;;  %v751_v23 = vcvt.s32.f32 %v301_v39  ;;  %v395_v2 = vunpack.c.3.s8 %v116_v31  ;;  %v2919_v42 = vld [vmem:[#allocation1 + $0x24] sm:$0xff]  ;;  %v2921_v43 = vld [vmem:[#allocation1 + $0x36] sm:$0xff] }
  0xaf   :  { %v1107_v32 = vpack.c.bf16 %v747_v22, %v657_v54  ;;  %v574_v54 = vunpack.c.2.s8 %v162_v16  ;;  %v575_v22 = vunpack.c.3.s8 %v162_v16 }
  0xb2   :  { %1869 = vmatpush.bf16.xpose.msra.mxu0 %v1100_v28  ;;  %1882 = vmatpush.bf16.xpose.msra.mxu1 %v1101_v33  ;;  %v1020_v28 = vcvt.s32.f32 %v570_v52  ;;  %v1021_v33 = vcvt.s32.f32 %v571_v21  ;;  %v660_v52 = vcvt.s32.f32 %v210_v35 }
  0xb3   :  { %1895 = vmatpush.bf16.xpose.msra.mxu2 %v1102_v27  ;;  %1908 = vmatpush.bf16.xpose.msra.mxu3 %v1103_v56  ;;  %v1104_v27 = vpack.c.bf16 %v744_v49, %v654_v48  ;;  %v1105_v56 = vpack.c.bf16 %v745_v51, %v655_v50  ;;  %v658_v48 = vcvt.s32.f32 %v208_v14  ;;  %v748_v49 = vcvt.s32.f32 %v298_v15  ;;  %v1389_v14 = vld [vmem:[#allocation1 + $0x9] sm:$0xff]  ;;  %v1391_v15 = vld [vmem:[#allocation1 + $0x1b] sm:$0xff] }
  0xb4   :  { %v1290_v0 = vpack.c.bf16 %v1020_v28, %v1020_v28  ;;  %v1291_v1 = vpack.c.bf16 %v1021_v33, %v1021_v33  ;;  %v659_v50 = vcvt.s32.f32 %v209_v19  ;;  %v749_v51 = vcvt.s32.f32 %v299_v20 }
  0xb5   :  { %v1108_v24 = vpack.c.bf16 %v748_v49, %v658_v48  ;;  %v1024_v28 = vcvt.s32.f32 %v574_v54  ;;  %v1025_v33 = vcvt.s32.f32 %v575_v22  ;;  %v845_v20 = vcvt.s32.f32 %v395_v2  ;;  %v2923_v48 = vld [vmem:[#allocation1 + $0x2d] sm:$0xff]  ;;  %v2925_v49 = vld [vmem:[#allocation1 + $0x3f] sm:$0xff] }
  0xb7   :  { %v1294_v4 = vpack.c.bf16 %v1024_v28, %v1024_v28 }
  0xb9   :  { %1870 = vmatmul.bf16.vlgmr.msra.gmra.mxu0 %v1378_v8  ;;  %1883 = vmatmul.bf16.vlgmr.msra.gmra.mxu1 %v1379_v10  ;;  %v840_v10 = vcvt.s32.f32 %v390_v62 }
  0xba   :  { %1919 = vmatpush.bf16.xpose.msrb.mxu0 %v1284_v58  ;;  %1932 = vmatpush.bf16.xpose.msrb.mxu1 %v1285_v59  ;;  %v388_v58 = vunpack.c.0.s8 %v115_v26  ;;  %v478_v59 = vunpack.c.0.s8 %v138_v55 }
  0xbb   :  { %1945 = vmatpush.bf16.xpose.msrb.mxu2 %v1286_v60  ;;  %1958 = vmatpush.bf16.xpose.msrb.mxu3 %v1287_v61  ;;  %v389_v60 = vunpack.c.1.s8 %v115_v26  ;;  %v479_v61 = vunpack.c.1.s8 %v138_v55  ;;  %v1109_v26 = vpack.c.bf16 %v749_v51, %v659_v50  ;;  %v54_v50 = vld [vmem:[#allocation2 + $0x28] sm:$0xff] }
  0xbc   :  { %1896 = vmatmul.bf16.vlgmr.msra.gmra.mxu2 %v1380_v9  ;;  %1909 = vmatmul.bf16.vlgmr.msra.gmra.mxu3 %v1381_v11  ;;  %v838_v6 = vcvt.s32.f32 %v388_v58  ;;  %v928_v7 = vcvt.s32.f32 %v478_v59  ;;  %v930_v11 = vcvt.s32.f32 %v480_v63  ;;  %v1574_v58 = vpop.f32.mrf.mxu1  ;;  %v392_v59 = vunpack.c.0.s8 %v116_v31  ;;  %1397 = vst [vmem:[#allocation1] ss:$9 sm:$0xff] %v54_v50 }
  0xbd   :  { %v839_v8 = vcvt.s32.f32 %v389_v60  ;;  %v929_v9 = vcvt.s32.f32 %v479_v61  ;;  %v393_v61 = vunpack.c.1.s8 %v116_v31  ;;  %v394_v63 = vunpack.c.2.s8 %v116_v31  ;;  %v117_v58 = vld [vmem:[#allocation5 + $0x1b8] sm:$0xff] }
  0xbe   :  { %v1200_v41 = vpack.c.bf16 %v930_v11, %v840_v10 }
  0xbf   :  { %v1199_v40 = vpack.c.bf16 %v929_v9, %v839_v8  ;;  %v842_v8 = vcvt.s32.f32 %v392_v59  ;;  %v843_v10 = vcvt.s32.f32 %v393_v61  ;;  %v140_v61 = vld [vmem:[#allocation5 + $0x26c] sm:$0xff] }
  0xc2   :  { %1920 = vmatpush.bf16.xpose.msrb.mxu0 %v1194_v36  ;;  %1933 = vmatpush.bf16.xpose.msrb.mxu1 %v1195_v37  ;;  %v300_v36 = vunpack.c.2.s8 %v92_v5  ;;  %v1198_v37 = vpack.c.bf16 %v928_v7, %v838_v6  ;;  %v1295_v5 = vpack.c.bf16 %v1025_v33, %v1025_v33  ;;  %v70_v6 = vld [vmem:[#allocation5 + $0x48] sm:$0xff]  ;;  %v93_v7 = vld [vmem:[#allocation5 + $0xfc] sm:$0xff] }
  0xc3   :  { %1946 = vmatpush.bf16.xpose.msrb.mxu2 %v1196_v44  ;;  %1959 = vmatpush.bf16.xpose.msrb.mxu3 %v1197_v45  ;;  %v572_v44 = vunpack.c.0.s8 %v162_v16  ;;  %v573_v45 = vunpack.c.1.s8 %v162_v16  ;;  %v844_v16 = vcvt.s32.f32 %v394_v63  ;;  %v212_v38 = vunpack.c.0.s8 %v70_v6 }
  0xc4   :  { %v750_v21 = vcvt.s32.f32 %v300_v36  ;;  %v302_v39 = vunpack.c.0.s8 %v93_v7  ;;  %v1624_v22 = vpop.f32.mrf.mxu1 }
  0xc6   :  { %v1110_v55 = vpack.c.bf16 %v750_v21, %v660_v52  ;;  %v305_v21 = vunpack.c.3.s8 %v93_v7 }
  0xca   :  { %1921 = vmatpush.bf16.xpose.msrb.mxu0 %v1104_v27  ;;  %1934 = vmatpush.bf16.xpose.msrb.mxu1 %v1105_v56  ;;  %v1585_v27 = vpop.f32.mrf.mxu2  ;;  %v1598_v56 = vpop.f32.mrf.mxu3 }
  0xcb   :  { %1947 = vmatpush.bf16.xpose.msrb.mxu2 %v1106_v29  ;;  %1960 = vmatpush.bf16.xpose.msrb.mxu3 %v1107_v32 }
  0xd1   :  { %1922 = vmatmul.bf16.vlgmr.msrb.gmra.mxu0 %v2907_v17  ;;  %1935 = vmatmul.bf16.vlgmr.msrb.gmra.mxu1 %v2911_v25  ;;  %v1022_v17 = vcvt.s32.f32 %v572_v44  ;;  %v1023_v25 = vcvt.s32.f32 %v573_v45  ;;  %v303_v44 = vunpack.c.1.s8 %v93_v7  ;;  %v214_v45 = vunpack.c.2.s8 %v70_v6 }
  0xd2   :  { %1971 = vmatpush.bf16.xpose.msra.mxu0 %v1288_v57  ;;  %1984 = vmatpush.bf16.xpose.msra.mxu1 %v1289_v34  ;;  %v1586_v57 = vadd.f32 %v1585_v27, %v1573_v47  ;;  %v1561_v34 = vpop.f32.mrf.mxu0  ;;  %v1587_v36 = vpop.f32.mrf.mxu2  ;;  %v215_v47 = vunpack.c.3.s8 %v70_v6 }
  0xd3   :  { %1997 = vmatpush.bf16.xpose.msra.mxu2 %v1290_v0  ;;  %2010 = vmatpush.bf16.xpose.msra.mxu3 %v1291_v1  ;;  %v1292_v29 = vpack.c.bf16 %v1022_v17, %v1022_v17  ;;  %v1293_v32 = vpack.c.bf16 %v1023_v25, %v1023_v25  ;;  %v71_v36 = vld [vmem:[#allocation5 + $0x50] sm:$0xff] }
  0xd4   :  { %1948 = vmatmul.bf16.vlgmr.msrb.gmra.mxu2 %v2909_v18  ;;  %1961 = vmatmul.bf16.vlgmr.msrb.gmra.mxu3 %v2913_v30  ;;  %v139_v18 = vld [vmem:[#allocation5 + $0x264] sm:$0xff]  ;;  %v1111_v30 = vpack.c.bf16 %v751_v23, %v661_v53  ;;  %v1599_v0 = vadd.f32 %v1598_v56, %v1586_v57  ;;  %v665_v33 = vcvt.s32.f32 %v215_v47  ;;  %v755_v56 = vcvt.s32.f32 %v305_v21 }
  0xd5   :  { %v482_v60 = vunpack.c.0.s8 %v139_v18  ;;  %v483_v62 = vunpack.c.1.s8 %v139_v18  ;;  %v484_v1 = vunpack.c.2.s8 %v139_v18  ;;  %v485_v3 = vunpack.c.3.s8 %v139_v18 }
  0xd6   :  { %v1115_v63 = vpack.c.bf16 %v755_v56, %v665_v33 }
  0xd7   :  { %v932_v9 = vcvt.s32.f32 %v482_v60  ;;  %v933_v11 = vcvt.s32.f32 %v483_v62  ;;  %v934_v19 = vcvt.s32.f32 %v484_v1  ;;  %v935_v35 = vcvt.s32.f32 %v485_v3 }
  0xd9   :  { %v1202_v51 = vpack.c.bf16 %v932_v9, %v842_v8  ;;  %v1203_v52 = vpack.c.bf16 %v933_v11, %v843_v10  ;;  %v1204_v53 = vpack.c.bf16 %v934_v19, %v844_v16  ;;  %v1205_v23 = vpack.c.bf16 %v935_v35, %v845_v20  ;;  %v1626_v8 = vpop.f32.mrf.mxu1 }
  0xda   :  { %1972 = vmatpush.bf16.xpose.msra.mxu0 %v1198_v37  ;;  %1985 = vmatpush.bf16.xpose.msra.mxu1 %v1199_v40  ;;  %v1600_v37 = vpop.f32.mrf.mxu3  ;;  %v213_v40 = vunpack.c.1.s8 %v70_v6  ;;  %v1611_v54 = vpop.f32.mrf.mxu0  ;;  %v396_v9 = vunpack.c.0.s8 %v117_v58  ;;  %v486_v10 = vunpack.c.0.s8 %v140_v61  ;;  %v397_v11 = vunpack.c.1.s8 %v117_v58 }
  0xdb   :  { %1998 = vmatpush.bf16.xpose.msra.mxu2 %v1200_v41  ;;  %2011 = vmatpush.bf16.xpose.msra.mxu3 %v1201_v46  ;;  %v163_v41 = vld [vmem:[#allocation5 + $0x320] sm:$0xff]  ;;  %v304_v46 = vunpack.c.2.s8 %v93_v7  ;;  %v1612_v31 = vadd.f32 %v1611_v54, %v1599_v0  ;;  %v1637_v1 = vpop.f32.mrf.mxu2  ;;  %v399_v16 = vunpack.c.3.s8 %v117_v58  ;;  %v489_v19 = vunpack.c.3.s8 %v140_v61 }
  0xdc   :  { %v576_v17 = vunpack.c.0.s8 %v163_v41  ;;  %v577_v25 = vunpack.c.1.s8 %v163_v41  ;;  %v663_v18 = vcvt.s32.f32 %v213_v40  ;;  %v94_v37 = vld [vmem:[#allocation5 + $0x104] sm:$0xff]  ;;  %v847_v40 = vcvt.s32.f32 %v397_v11 }
  0xdd   :  { %v754_v28 = vcvt.s32.f32 %v304_v46  ;;  %v1625_v27 = vadd.f32 %v1624_v22, %v1612_v31  ;;  %v849_v46 = vcvt.s32.f32 %v399_v16  ;;  %v939_v47 = vcvt.s32.f32 %v489_v19 }
  0xde   :  { %v1026_v57 = vcvt.s32.f32 %v576_v17  ;;  %v1027_v34 = vcvt.s32.f32 %v577_v25  ;;  %v306_v21 = vunpack.c.0.s8 %v94_v37  ;;  %v307_v54 = vunpack.c.1.s8 %v94_v37 }
  0xdf   :  { %v1638_v6 = vadd.f32 %v1637_v1, %v1625_v27  ;;  %v218_v22 = vunpack.c.2.s8 %v71_v36  ;;  %v308_v17 = vunpack.c.2.s8 %v94_v37  ;;  %v219_v25 = vunpack.c.3.s8 %v71_v36  ;;  %v118_v1 = vld [vmem:[#allocation5 + $0x1c0] sm:$0xff] }
  0xe0   :  { %v401_v16 = vunpack.c.1.s8 %v118_v1 }
  0xe2   :  { %1973 = vmatpush.bf16.xpose.msra.mxu0 %v1108_v24  ;;  %1986 = vmatpush.bf16.xpose.msra.mxu1 %v1109_v26  ;;  %v662_v24 = vcvt.s32.f32 %v212_v38  ;;  %v752_v26 = vcvt.s32.f32 %v302_v39  ;;  %v1650_v3 = vpop.f32.mrf.mxu3  ;;  %v1613_v7 = vpop.f32.mrf.mxu0  ;;  %v846_v38 = vcvt.s32.f32 %v396_v9  ;;  %v936_v39 = vcvt.s32.f32 %v486_v10 }
  0xe3   :  { %1999 = vmatpush.bf16.xpose.msra.mxu2 %v1110_v55  ;;  %2012 = vmatpush.bf16.xpose.msra.mxu3 %v1111_v30  ;;  %v753_v55 = vcvt.s32.f32 %v303_v44  ;;  %v664_v30 = vcvt.s32.f32 %v214_v45  ;;  %v1639_v50 = vpop.f32.mrf.mxu2 }
  0xe4   :  { %v1112_v59 = vpack.c.bf16 %v752_v26, %v662_v24  ;;  %v1206_v31 = vpack.c.bf16 %v936_v39, %v846_v38  ;;  %v309_v26 = vunpack.c.3.s8 %v94_v37  ;;  %v403_v37 = vunpack.c.3.s8 %v118_v1 }
  0xe5   :  { %v1113_v60 = vpack.c.bf16 %v753_v55, %v663_v18  ;;  %v1114_v62 = vpack.c.bf16 %v754_v28, %v664_v30  ;;  %v1209_v55 = vpack.c.bf16 %v939_v47, %v849_v46  ;;  %v1676_v28 = vpop.f32.mrf.mxu1  ;;  %v851_v47 = vcvt.s32.f32 %v401_v16  ;;  %v142_v16 = vld [vmem:[#allocation5 + $0x27c] sm:$0xff] }
  0xe9   :  { %1974 = vmatmul.bf16.vlgmr.msra.gmra.mxu0 %v1388_v12  ;;  %1987 = vmatmul.bf16.vlgmr.msra.gmra.mxu1 %v1389_v14  ;;  %v487_v12 = vunpack.c.1.s8 %v140_v61  ;;  %v1651_v14 = vadd.f32 %v1650_v3, %v1638_v6 }
  0xea   :  { %2023 = vmatpush.bf16.xpose.msrb.mxu0 %v1292_v29  ;;  %2036 = vmatpush.bf16.xpose.msrb.mxu1 %v1293_v32  ;;  %v578_v29 = vunpack.c.2.s8 %v163_v41  ;;  %v579_v32 = vunpack.c.3.s8 %v163_v41  ;;  %v1663_v30 = vpop.f32.mrf.mxu0 }
  0xeb   :  { %2049 = vmatpush.bf16.xpose.msrb.mxu2 %v1294_v4  ;;  %2062 = vmatpush.bf16.xpose.msrb.mxu3 %v1295_v5  ;;  %v1296_v4 = vpack.c.bf16 %v1026_v57, %v1026_v57  ;;  %v1297_v5 = vpack.c.bf16 %v1027_v34, %v1027_v34  ;;  %v937_v41 = vcvt.s32.f32 %v487_v12  ;;  %v1664_v56 = vadd.f32 %v1663_v30, %v1651_v14  ;;  %v1689_v6 = vpop.f32.mrf.mxu2  ;;  %v2931_v30 = vld [vmem:[#allocation1 + $0x24] sm:$0xff] }
  0xec   :  { %2000 = vmatmul.bf16.vlgmr.msra.gmra.mxu2 %v1390_v13  ;;  %2013 = vmatmul.bf16.vlgmr.msra.gmra.mxu3 %v1391_v15  ;;  %v1028_v0 = vcvt.s32.f32 %v578_v29  ;;  %v1029_v2 = vcvt.s32.f32 %v579_v32  ;;  %v398_v13 = vunpack.c.2.s8 %v117_v58  ;;  %v488_v15 = vunpack.c.2.s8 %v140_v61 }
  0xed   :  { %v1207_v24 = vpack.c.bf16 %v937_v41, %v847_v40  ;;  %v756_v32 = vcvt.s32.f32 %v306_v21  ;;  %v757_v34 = vcvt.s32.f32 %v307_v54  ;;  %v668_v58 = vcvt.s32.f32 %v218_v22  ;;  %v72_v41 = vld [vmem:[#allocation5 + $0x58] sm:$0xff]  ;;  %v1399_v21 = vld [vmem:[#allocation1 + $0x9] sm:$0xff] }
  0xee   :  { %v1298_v20 = vpack.c.bf16 %v1028_v0, %v1028_v0  ;;  %v1299_v35 = vpack.c.bf16 %v1029_v2, %v1029_v2  ;;  %v848_v44 = vcvt.s32.f32 %v398_v13  ;;  %v938_v45 = vcvt.s32.f32 %v488_v15  ;;  %v1678_v13 = vpop.f32.mrf.mxu1 }
  0xef   :  { %v1677_v61 = vadd.f32 %v1676_v28, %v1664_v56  ;;  %v400_v14 = vunpack.c.0.s8 %v118_v1  ;;  %v853_v22 = vcvt.s32.f32 %v403_v37  ;;  %v2933_v28 = vld [vmem:[#allocation1 + $0x36] sm:$0xff]  ;;  %v119_v13 = vld [vmem:[#allocation5 + $0x1c8] sm:$0xff] }
  0xf0   :  { %v1208_v18 = vpack.c.bf16 %v938_v45, %v848_v44  ;;  %v95_v44 = vld [vmem:[#allocation5 + $0x10c] sm:$0xff] }
  0xf1   :  { %v1690_v11 = vadd.f32 %v1689_v6, %v1677_v61  ;;  %v850_v45 = vcvt.s32.f32 %v400_v14  ;;  %v312_v56 = vunpack.c.2.s8 %v95_v44 }
  0xf2   :  { %2024 = vmatpush.bf16.xpose.msrb.mxu0 %v1202_v51  ;;  %2037 = vmatpush.bf16.xpose.msrb.mxu1 %v1203_v52  ;;  %v1652_v51 = vpop.f32.mrf.mxu3  ;;  %v216_v52 = vunpack.c.0.s8 %v71_v36  ;;  %v1665_v12 = vpop.f32.mrf.mxu0 }
  0xf3   :  { %2050 = vmatpush.bf16.xpose.msrb.mxu2 %v1204_v53  ;;  %2063 = vmatpush.bf16.xpose.msrb.mxu3 %v1205_v23  ;;  %v217_v53 = vunpack.c.1.s8 %v71_v36  ;;  %v164_v23 = vld [vmem:[#allocation5 + $0x328] sm:$0xff]  ;;  %v1398_v51 = vld [vmem:[#allocation1] sm:$0xff] }
  0xf4   :  { %v580_v33 = vunpack.c.0.s8 %v164_v23  ;;  %v581_v27 = vunpack.c.1.s8 %v164_v23  ;;  %v666_v29 = vcvt.s32.f32 %v216_v52  ;;  %v583_v0 = vunpack.c.3.s8 %v164_v23  ;;  %v1400_v52 = vld [vmem:[#allocation1 + $0x12] sm:$0xff] }
  0xf5   :  { %v667_v57 = vcvt.s32.f32 %v217_v53  ;;  %v1401_v53 = vld [vmem:[#allocation1 + $0x1b] sm:$0xff] }
  0xf6   :  { %v1116_v2 = vpack.c.bf16 %v756_v32, %v666_v29  ;;  %v1033_v7 = vcvt.s32.f32 %v583_v0  ;;  %v223_v29 = vunpack.c.3.s8 %v72_v41  ;;  %v2935_v32 = vld [vmem:[#allocation1 + $0x2d] sm:$0xff]  ;;  %v1728_v0 = vpop.f32.mrf.mxu1 }
  0xf7   :  { %v1117_v3 = vpack.c.bf16 %v757_v34, %v667_v57  ;;  %v2937_v57 = vld [vmem:[#allocation1 + $0x3f] sm:$0xff] }
  0xf8   :  { %v1303_v40 = vpack.c.bf16 %v1033_v7, %v1033_v7  ;;  %v55_v34 = vld [vmem:[#allocation2 + $0x30] sm:$0xff]  ;;  %v673_v6 = vcvt.s32.f32 %v223_v29 }
  0xf9   :  { %1407 = vst [vmem:[#allocation1] ss:$9 sm:$0xff] %v55_v34 }
  0xfa   :  { %2025 = vmatpush.bf16.xpose.msrb.mxu0 %v1112_v59  ;;  %2038 = vmatpush.bf16.xpose.msrb.mxu1 %v1113_v60  ;;  %v758_v59 = vcvt.s32.f32 %v308_v17  ;;  %v669_v60 = vcvt.s32.f32 %v219_v25  ;;  %v1702_v8 = vpop.f32.mrf.mxu3  ;;  %v1691_v25 = vpop.f32.mrf.mxu2 }
  0xfb   :  { %2051 = vmatpush.bf16.xpose.msrb.mxu2 %v1114_v62  ;;  %2064 = vmatpush.bf16.xpose.msrb.mxu3 %v1115_v63  ;;  %v759_v62 = vcvt.s32.f32 %v309_v26  ;;  %v582_v63 = vunpack.c.2.s8 %v164_v23  ;;  %v310_v26 = vunpack.c.0.s8 %v95_v44  ;;  %v73_v25 = vld [vmem:[#allocation5 + $0x60] sm:$0xff] }
 0x101   :  { %2026 = vmatmul.bf16.vlgmr.msrb.gmra.mxu0 %v2919_v42  ;;  %2039 = vmatmul.bf16.vlgmr.msrb.gmra.mxu1 %v2923_v48  ;;  %v1030_v42 = vcvt.s32.f32 %v580_v33  ;;  %v1031_v48 = vcvt.s32.f32 %v581_v27  ;;  %v311_v33 = vunpack.c.1.s8 %v95_v44  ;;  %v222_v27 = vunpack.c.2.s8 %v72_v41 }
 0x102   :  { %2075 = vmatpush.bf16.xpose.msra.mxu0 %v1296_v4  ;;  %2088 = vmatpush.bf16.xpose.msra.mxu1 %v1297_v5  ;;  %v1118_v4 = vpack.c.bf16 %v758_v59, %v668_v58  ;;  %v1032_v5 = vcvt.s32.f32 %v582_v63  ;;  %v1715_v63 = vpop.f32.mrf.mxu0 }
 0x103   :  { %2101 = vmatpush.bf16.xpose.msra.mxu2 %v1298_v20  ;;  %2114 = vmatpush.bf16.xpose.msra.mxu3 %v1299_v35  ;;  %v1300_v9 = vpack.c.bf16 %v1030_v42, %v1030_v42  ;;  %v1301_v10 = vpack.c.bf16 %v1031_v48, %v1031_v48  ;;  %v402_v20 = vunpack.c.2.s8 %v118_v1  ;;  %v1703_v35 = vadd.f32 %v1702_v8, %v1690_v11 }
 0x104   :  { %2052 = vmatmul.bf16.vlgmr.msrb.gmra.mxu2 %v2921_v43  ;;  %2065 = vmatmul.bf16.vlgmr.msrb.gmra.mxu3 %v2925_v49  ;;  %v141_v43 = vld [vmem:[#allocation5 + $0x274] sm:$0xff]  ;;  %v1119_v49 = vpack.c.bf16 %v759_v62, %v669_v60  ;;  %v1302_v39 = vpack.c.bf16 %v1032_v5, %v1032_v5  ;;  %v313_v60 = vunpack.c.3.s8 %v95_v44  ;;  %v762_v5 = vcvt.s32.f32 %v312_v56 }
 0x105   :  { %v490_v15 = vunpack.c.0.s8 %v141_v43  ;;  %v491_v19 = vunpack.c.1.s8 %v141_v43  ;;  %v492_v36 = vunpack.c.2.s8 %v141_v43  ;;  %v493_v38 = vunpack.c.3.s8 %v141_v43 }
 0x106   :  { %v852_v23 = vcvt.s32.f32 %v402_v20  ;;  %v1716_v1 = vadd.f32 %v1715_v63, %v1703_v35  ;;  %v763_v8 = vcvt.s32.f32 %v313_v60 }
 0x107   :  { %v940_v46 = vcvt.s32.f32 %v490_v15  ;;  %v941_v50 = vcvt.s32.f32 %v491_v19  ;;  %v942_v54 = vcvt.s32.f32 %v492_v36  ;;  %v943_v17 = vcvt.s32.f32 %v493_v38  ;;  %v1741_v36 = vpop.f32.mrf.mxu2 }
 0x108   :  { %v1729_v7 = vadd.f32 %v1728_v0, %v1716_v1  ;;  %v1123_v20 = vpack.c.bf16 %v763_v8, %v673_v6  ;;  %v226_v0 = vunpack.c.2.s8 %v73_v25 }
 0x109   :  { %v1210_v58 = vpack.c.bf16 %v940_v46, %v850_v45  ;;  %v1211_v59 = vpack.c.bf16 %v941_v50, %v851_v47  ;;  %v1212_v61 = vpack.c.bf16 %v942_v54, %v852_v23  ;;  %v1213_v62 = vpack.c.bf16 %v943_v17, %v853_v22  ;;  %v1730_v45 = vpop.f32.mrf.mxu1 }
 0x10a   :  { %2076 = vmatpush.bf16.xpose.msra.mxu0 %v1206_v31  ;;  %2089 = vmatpush.bf16.xpose.msra.mxu1 %v1207_v24  ;;  %v1704_v31 = vpop.f32.mrf.mxu3  ;;  %v220_v24 = vunpack.c.0.s8 %v72_v41  ;;  %v1717_v44 = vpop.f32.mrf.mxu0  ;;  %v404_v46 = vunpack.c.0.s8 %v119_v13  ;;  %v494_v47 = vunpack.c.0.s8 %v142_v16  ;;  %v405_v50 = vunpack.c.1.s8 %v119_v13 }
 0x10b   :  { %2102 = vmatpush.bf16.xpose.msra.mxu2 %v1208_v18  ;;  %2115 = vmatpush.bf16.xpose.msra.mxu3 %v1209_v55  ;;  %v221_v18 = vunpack.c.1.s8 %v72_v41  ;;  %v165_v55 = vld [vmem:[#allocation5 + $0x330] sm:$0xff]  ;;  %v1742_v41 = vadd.f32 %v1741_v36, %v1729_v7  ;;  %v407_v23 = vunpack.c.3.s8 %v119_v13  ;;  %v497_v54 = vunpack.c.3.s8 %v142_v16 }
 0x10c   :  { %v584_v42 = vunpack.c.0.s8 %v165_v55  ;;  %v585_v48 = vunpack.c.1.s8 %v165_v55  ;;  %v96_v31 = vld [vmem:[#allocation5 + $0x114] sm:$0xff] }
 0x10d   :  { %v671_v43 = vcvt.s32.f32 %v221_v18  ;;  %v855_v18 = vcvt.s32.f32 %v405_v50  ;;  %v857_v56 = vcvt.s32.f32 %v407_v23  ;;  %v947_v29 = vcvt.s32.f32 %v497_v54  ;;  %v120_v36 = vld [vmem:[#allocation5 + $0x1d0] sm:$0xff] }
 0x10e   :  { %v1034_v11 = vcvt.s32.f32 %v584_v42  ;;  %v1035_v12 = vcvt.s32.f32 %v585_v48  ;;  %v314_v60 = vunpack.c.0.s8 %v96_v31  ;;  %v315_v63 = vunpack.c.1.s8 %v96_v31 }
 0x10f   :  { %v1743_v34 = vpop.f32.mrf.mxu2  ;;  %v316_v42 = vunpack.c.2.s8 %v96_v31  ;;  %v227_v48 = vunpack.c.3.s8 %v73_v25  ;;  %v409_v23 = vunpack.c.1.s8 %v120_v36 }
 0x112   :  { %2077 = vmatpush.bf16.xpose.msra.mxu0 %v1116_v2  ;;  %2090 = vmatpush.bf16.xpose.msra.mxu1 %v1117_v3  ;;  %v670_v2 = vcvt.s32.f32 %v220_v24  ;;  %v760_v3 = vcvt.s32.f32 %v310_v26  ;;  %v1754_v38 = vpop.f32.mrf.mxu3  ;;  %v854_v24 = vcvt.s32.f32 %v404_v46  ;;  %v944_v26 = vcvt.s32.f32 %v494_v47 }
 0x113   :  { %2103 = vmatpush.bf16.xpose.msra.mxu2 %v1118_v4  ;;  %2116 = vmatpush.bf16.xpose.msra.mxu3 %v1119_v49  ;;  %v761_v4 = vcvt.s32.f32 %v311_v33  ;;  %v672_v49 = vcvt.s32.f32 %v222_v27 }
 0x114   :  { %v1120_v14 = vpack.c.bf16 %v760_v3, %v670_v2  ;;  %v1214_v1 = vpack.c.bf16 %v944_v26, %v854_v24  ;;  %v317_v3 = vunpack.c.3.s8 %v96_v31  ;;  %v411_v31 = vunpack.c.3.s8 %v120_v36 }
 0x115   :  { %v1121_v15 = vpack.c.bf16 %v761_v4, %v671_v43  ;;  %v1122_v19 = vpack.c.bf16 %v762_v5, %v672_v49  ;;  %v1217_v4 = vpack.c.bf16 %v947_v29, %v857_v56  ;;  %v1767_v49 = vpop.f32.mrf.mxu0  ;;  %v1780_v5 = vpop.f32.mrf.mxu1  ;;  %v859_v29 = vcvt.s32.f32 %v409_v23  ;;  %v144_v23 = vld [vmem:[#allocation5 + $0x28c] sm:$0xff] }
 0x119   :  { %2078 = vmatmul.bf16.vlgmr.msra.gmra.mxu0 %v1398_v51  ;;  %2091 = vmatmul.bf16.vlgmr.msra.gmra.mxu1 %v1399_v21  ;;  %v495_v51 = vunpack.c.1.s8 %v142_v16  ;;  %v1755_v21 = vadd.f32 %v1754_v38, %v1742_v41  ;;  %v1793_v41 = vpop.f32.mrf.mxu2 }
 0x11a   :  { %2127 = vmatpush.bf16.xpose.msrb.mxu0 %v1300_v9  ;;  %2140 = vmatpush.bf16.xpose.msrb.mxu1 %v1301_v10  ;;  %v586_v9 = vunpack.c.2.s8 %v165_v55  ;;  %v587_v10 = vunpack.c.3.s8 %v165_v55 }
 0x11b   :  { %2153 = vmatpush.bf16.xpose.msrb.mxu2 %v1302_v39  ;;  %2166 = vmatpush.bf16.xpose.msrb.mxu3 %v1303_v40  ;;  %v1304_v39 = vpack.c.bf16 %v1034_v11, %v1034_v11  ;;  %v1305_v40 = vpack.c.bf16 %v1035_v12, %v1035_v12  ;;  %v945_v55 = vcvt.s32.f32 %v495_v51  ;;  %v1768_v8 = vadd.f32 %v1767_v49, %v1755_v21  ;;  %v2943_v49 = vld [vmem:[#allocation1 + $0x24] sm:$0xff] }
 0x11c   :  { %2104 = vmatmul.bf16.vlgmr.msra.gmra.mxu2 %v1400_v52  ;;  %2117 = vmatmul.bf16.vlgmr.msra.gmra.mxu3 %v1401_v53  ;;  %v1036_v35 = vcvt.s32.f32 %v586_v9  ;;  %v1037_v37 = vcvt.s32.f32 %v587_v10  ;;  %v406_v52 = vunpack.c.2.s8 %v119_v13  ;;  %v496_v53 = vunpack.c.2.s8 %v142_v16 }
 0x11d   :  { %v1215_v2 = vpack.c.bf16 %v945_v55, %v855_v18  ;;  %v764_v10 = vcvt.s32.f32 %v314_v60  ;;  %v765_v12 = vcvt.s32.f32 %v315_v63  ;;  %v676_v13 = vcvt.s32.f32 %v226_v0  ;;  %v1769_v51 = vpop.f32.mrf.mxu0  ;;  %v74_v55 = vld [vmem:[#allocation5 + $0x68] sm:$0xff] }
 0x11e   :  { %v1306_v22 = vpack.c.bf16 %v1036_v35, %v1036_v35  ;;  %v1307_v17 = vpack.c.bf16 %v1037_v37, %v1037_v37  ;;  %v856_v33 = vcvt.s32.f32 %v406_v52  ;;  %v946_v27 = vcvt.s32.f32 %v496_v53  ;;  %v1782_v52 = vpop.f32.mrf.mxu1  ;;  %v1409_v60 = vld [vmem:[#allocation1 + $0x9] sm:$0xff] }
 0x11f   :  { %v1781_v16 = vadd.f32 %v1780_v5, %v1768_v8  ;;  %v408_v21 = vunpack.c.0.s8 %v120_v36  ;;  %v861_v0 = vcvt.s32.f32 %v411_v31  ;;  %v2945_v5 = vld [vmem:[#allocation1 + $0x36] sm:$0xff] }
 0x120   :  { %v1216_v43 = vpack.c.bf16 %v946_v27, %v856_v33  ;;  %v97_v33 = vld [vmem:[#allocation5 + $0x11c] sm:$0xff] }
 0x121   :  { %v1794_v50 = vadd.f32 %v1793_v41, %v1781_v16  ;;  %v858_v27 = vcvt.s32.f32 %v408_v21  ;;  %v320_v8 = vunpack.c.2.s8 %v97_v33  ;;  %v121_v52 = vld [vmem:[#allocation5 + $0x1d8] sm:$0xff] }
 0x122   :  { %2128 = vmatpush.bf16.xpose.msrb.mxu0 %v1210_v58  ;;  %2141 = vmatpush.bf16.xpose.msrb.mxu1 %v1211_v59  ;;  %v1756_v58 = vpop.f32.mrf.mxu3  ;;  %v224_v59 = vunpack.c.0.s8 %v73_v25 }
 0x123   :  { %2154 = vmatpush.bf16.xpose.msrb.mxu2 %v1212_v61  ;;  %2167 = vmatpush.bf16.xpose.msrb.mxu3 %v1213_v62  ;;  %v225_v61 = vunpack.c.1.s8 %v73_v25  ;;  %v166_v62 = vld [vmem:[#allocation5 + $0x338] sm:$0xff] }
 0x124   :  { %v588_v6 = vunpack.c.0.s8 %v166_v62  ;;  %v589_v7 = vunpack.c.1.s8 %v166_v62  ;;  %v674_v9 = vcvt.s32.f32 %v224_v59  ;;  %v591_v35 = vunpack.c.3.s8 %v166_v62  ;;  %v1408_v58 = vld [vmem:[#allocation1] sm:$0xff]  ;;  %v1410_v59 = vld [vmem:[#allocation1 + $0x12] sm:$0xff] }
 0x125   :  { %v675_v11 = vcvt.s32.f32 %v225_v61  ;;  %v1411_v61 = vld [vmem:[#allocation1 + $0x1b] sm:$0xff] }
 0x126   :  { %v1124_v37 = vpack.c.bf16 %v764_v10, %v674_v9  ;;  %v1041_v44 = vcvt.s32.f32 %v591_v35  ;;  %v231_v9 = vunpack.c.3.s8 %v74_v55  ;;  %v2947_v10 = vld [vmem:[#allocation1 + $0x2d] sm:$0xff]  ;;  %v1832_v35 = vpop.f32.mrf.mxu1 }
 0x127   :  { %v1125_v38 = vpack.c.bf16 %v765_v12, %v675_v11  ;;  %v2949_v11 = vld [vmem:[#allocation1 + $0x3f] sm:$0xff] }
 0x128   :  { %v1311_v18 = vpack.c.bf16 %v1041_v44, %v1041_v44  ;;  %v56_v12 = vld [vmem:[#allocation2 + $0x38] sm:$0xff]  ;;  %v681_v41 = vcvt.s32.f32 %v231_v9 }
 0x129   :  { %1417 = vst [vmem:[#allocation1] ss:$9 sm:$0xff] %v56_v12 }
 0x12a   :  { %2129 = vmatpush.bf16.xpose.msrb.mxu0 %v1120_v14  ;;  %2142 = vmatpush.bf16.xpose.msrb.mxu1 %v1121_v15  ;;  %v766_v14 = vcvt.s32.f32 %v316_v42  ;;  %v677_v15 = vcvt.s32.f32 %v227_v48  ;;  %v1806_v45 = vpop.f32.mrf.mxu3  ;;  %v1795_v48 = vpop.f32.mrf.mxu2 }
 0x12b   :  { %2155 = vmatpush.bf16.xpose.msrb.mxu2 %v1122_v19  ;;  %2168 = vmatpush.bf16.xpose.msrb.mxu3 %v1123_v20  ;;  %v767_v19 = vcvt.s32.f32 %v317_v3  ;;  %v590_v20 = vunpack.c.2.s8 %v166_v62  ;;  %v318_v3 = vunpack.c.0.s8 %v97_v33  ;;  %v75_v48 = vld [vmem:[#allocation5 + $0x70] sm:$0xff] }
 0x131   :  { %2130 = vmatmul.bf16.vlgmr.msrb.gmra.mxu0 %v2931_v30  ;;  %2143 = vmatmul.bf16.vlgmr.msrb.gmra.mxu1 %v2935_v32  ;;  %v1038_v30 = vcvt.s32.f32 %v588_v6  ;;  %v1039_v32 = vcvt.s32.f32 %v589_v7  ;;  %v319_v6 = vunpack.c.1.s8 %v97_v33  ;;  %v230_v7 = vunpack.c.2.s8 %v74_v55 }
 0x132   :  { %2179 = vmatpush.bf16.xpose.msra.mxu0 %v1304_v39  ;;  %2192 = vmatpush.bf16.xpose.msra.mxu1 %v1305_v40  ;;  %v1126_v39 = vpack.c.bf16 %v766_v14, %v676_v13  ;;  %v1040_v40 = vcvt.s32.f32 %v590_v20  ;;  %v1819_v20 = vpop.f32.mrf.mxu0 }
 0x133   :  { %2205 = vmatpush.bf16.xpose.msra.mxu2 %v1306_v22  ;;  %2218 = vmatpush.bf16.xpose.msra.mxu3 %v1307_v17  ;;  %v1308_v46 = vpack.c.bf16 %v1038_v30, %v1038_v30  ;;  %v1309_v47 = vpack.c.bf16 %v1039_v32, %v1039_v32  ;;  %v410_v22 = vunpack.c.2.s8 %v120_v36  ;;  %v1807_v17 = vadd.f32 %v1806_v45, %v1794_v50 }
 0x134   :  { %2156 = vmatmul.bf16.vlgmr.msrb.gmra.mxu2 %v2933_v28  ;;  %2169 = vmatmul.bf16.vlgmr.msrb.gmra.mxu3 %v2937_v57  ;;  %v143_v28 = vld [vmem:[#allocation5 + $0x284] sm:$0xff]  ;;  %v1127_v57 = vpack.c.bf16 %v767_v19, %v677_v15  ;;  %v1310_v26 = vpack.c.bf16 %v1040_v40, %v1040_v40  ;;  %v321_v15 = vunpack.c.3.s8 %v97_v33  ;;  %v770_v40 = vcvt.s32.f32 %v320_v8 }
 0x135   :  { %v498_v53 = vunpack.c.0.s8 %v143_v28  ;;  %v499_v54 = vunpack.c.1.s8 %v143_v28  ;;  %v500_v25 = vunpack.c.2.s8 %v143_v28  ;;  %v501_v24 = vunpack.c.3.s8 %v143_v28 }
 0x136   :  { %v860_v62 = vcvt.s32.f32 %v410_v22  ;;  %v1820_v36 = vadd.f32 %v1819_v20, %v1807_v17  ;;  %v771_v45 = vcvt.s32.f32 %v321_v15 }
 0x137   :  { %v948_v56 = vcvt.s32.f32 %v498_v53  ;;  %v949_v34 = vcvt.s32.f32 %v499_v54  ;;  %v950_v63 = vcvt.s32.f32 %v500_v25  ;;  %v951_v42 = vcvt.s32.f32 %v501_v24  ;;  %v1845_v25 = vpop.f32.mrf.mxu2 }
 0x138   :  { %v1833_v44 = vadd.f32 %v1832_v35, %v1820_v36  ;;  %v1131_v22 = vpack.c.bf16 %v771_v45, %v681_v41  ;;  %v234_v35 = vunpack.c.2.s8 %v75_v48 }
 0x139   :  { %v1218_v13 = vpack.c.bf16 %v948_v56, %v858_v27  ;;  %v1219_v14 = vpack.c.bf16 %v949_v34, %v859_v29  ;;  %v1220_v16 = vpack.c.bf16 %v950_v63, %v860_v62  ;;  %v1221_v19 = vpack.c.bf16 %v951_v42, %v861_v0  ;;  %v1834_v27 = vpop.f32.mrf.mxu1 }
 0x13a   :  { %2180 = vmatpush.bf16.xpose.msra.mxu0 %v1214_v1  ;;  %2193 = vmatpush.bf16.xpose.msra.mxu1 %v1215_v2  ;;  %v1808_v1 = vpop.f32.mrf.mxu3  ;;  %v228_v2 = vunpack.c.0.s8 %v74_v55  ;;  %v1821_v33 = vpop.f32.mrf.mxu0  ;;  %v412_v56 = vunpack.c.0.s8 %v121_v52  ;;  %v502_v29 = vunpack.c.0.s8 %v144_v23  ;;  %v413_v34 = vunpack.c.1.s8 %v121_v52 }
 0x13b   :  { %2206 = vmatpush.bf16.xpose.msra.mxu2 %v1216_v43  ;;  %2219 = vmatpush.bf16.xpose.msra.mxu3 %v1217_v4  ;;  %v229_v43 = vunpack.c.1.s8 %v74_v55  ;;  %v167_v4 = vld [vmem:[#allocation5 + $0x340] sm:$0xff]  ;;  %v1846_v55 = vadd.f32 %v1845_v25, %v1833_v44  ;;  %v415_v62 = vunpack.c.3.s8 %v121_v52  ;;  %v505_v63 = vunpack.c.3.s8 %v144_v23 }
 0x13c   :  { %v592_v30 = vunpack.c.0.s8 %v167_v4  ;;  %v593_v32 = vunpack.c.1.s8 %v167_v4  ;;  %v98_v1 = vld [vmem:[#allocation5 + $0x124] sm:$0xff] }
 0x13d   :  { %v679_v28 = vcvt.s32.f32 %v229_v43  ;;  %v863_v43 = vcvt.s32.f32 %v413_v34  ;;  %v865_v8 = vcvt.s32.f32 %v415_v62  ;;  %v955_v9 = vcvt.s32.f32 %v505_v63  ;;  %v122_v25 = vld [vmem:[#allocation5 + $0x1e0] sm:$0xff] }
 0x13e   :  { %v1042_v50 = vcvt.s32.f32 %v592_v30  ;;  %v1043_v51 = vcvt.s32.f32 %v593_v32  ;;  %v322_v15 = vunpack.c.0.s8 %v98_v1  ;;  %v323_v20 = vunpack.c.1.s8 %v98_v1 }
 0x13f   :  { %v1847_v12 = vpop.f32.mrf.mxu2  ;;  %v324_v30 = vunpack.c.2.s8 %v98_v1  ;;  %v235_v32 = vunpack.c.3.s8 %v75_v48  ;;  %v417_v62 = vunpack.c.1.s8 %v122_v25 }
 0x142   :  { %2181 = vmatpush.bf16.xpose.msra.mxu0 %v1124_v37  ;;  %2194 = vmatpush.bf16.xpose.msra.mxu1 %v1125_v38  ;;  %v678_v37 = vcvt.s32.f32 %v228_v2  ;;  %v768_v38 = vcvt.s32.f32 %v318_v3  ;;  %v1858_v24 = vpop.f32.mrf.mxu3  ;;  %v862_v2 = vcvt.s32.f32 %v412_v56  ;;  %v952_v3 = vcvt.s32.f32 %v502_v29 }
 0x143   :  { %2207 = vmatpush.bf16.xpose.msra.mxu2 %v1126_v39  ;;  %2220 = vmatpush.bf16.xpose.msra.mxu3 %v1127_v57  ;;  %v769_v39 = vcvt.s32.f32 %v319_v6  ;;  %v680_v57 = vcvt.s32.f32 %v230_v7 }
 0x144   :  { %v1128_v21 = vpack.c.bf16 %v768_v38, %v678_v37  ;;  %v1222_v36 = vpack.c.bf16 %v952_v3, %v862_v2  ;;  %v325_v38 = vunpack.c.3.s8 %v98_v1  ;;  %v419_v1 = vunpack.c.3.s8 %v122_v25 }
 0x145   :  { %v1129_v53 = vpack.c.bf16 %v769_v39, %v679_v28  ;;  %v1130_v54 = vpack.c.bf16 %v770_v40, %v680_v57  ;;  %v1225_v39 = vpack.c.bf16 %v955_v9, %v865_v8  ;;  %v1871_v57 = vpop.f32.mrf.mxu0  ;;  %v1884_v40 = vpop.f32.mrf.mxu1  ;;  %v867_v9 = vcvt.s32.f32 %v417_v62  ;;  %v146_v62 = vld [vmem:[#allocation5 + $0x29c] sm:$0xff] }
 0x149   :  { %2182 = vmatmul.bf16.vlgmr.msra.gmra.mxu0 %v1408_v58  ;;  %2195 = vmatmul.bf16.vlgmr.msra.gmra.mxu1 %v1409_v60  ;;  %v503_v58 = vunpack.c.1.s8 %v144_v23  ;;  %v1859_v60 = vadd.f32 %v1858_v24, %v1846_v55  ;;  %v1897_v55 = vpop.f32.mrf.mxu2 }
 0x14a   :  { %2231 = vmatpush.bf16.xpose.msrb.mxu0 %v1308_v46  ;;  %2244 = vmatpush.bf16.xpose.msrb.mxu1 %v1309_v47  ;;  %v594_v46 = vunpack.c.2.s8 %v167_v4  ;;  %v595_v47 = vunpack.c.3.s8 %v167_v4 }
 0x14b   :  { %2257 = vmatpush.bf16.xpose.msrb.mxu2 %v1310_v26  ;;  %2270 = vmatpush.bf16.xpose.msrb.mxu3 %v1311_v18  ;;  %v1312_v26 = vpack.c.bf16 %v1042_v50, %v1042_v50  ;;  %v1313_v18 = vpack.c.bf16 %v1043_v51, %v1043_v51  ;;  %v953_v4 = vcvt.s32.f32 %v503_v58  ;;  %v1872_v45 = vadd.f32 %v1871_v57, %v1859_v60  ;;  %v2955_v57 = vld [vmem:[#allocation1 + $0x24] sm:$0xff] }
 0x14c   :  { %2208 = vmatmul.bf16.vlgmr.msra.gmra.mxu2 %v1410_v59  ;;  %2221 = vmatmul.bf16.vlgmr.msra.gmra.mxu3 %v1411_v61  ;;  %v1044_v17 = vcvt.s32.f32 %v594_v46  ;;  %v1045_v31 = vcvt.s32.f32 %v595_v47  ;;  %v414_v59 = vunpack.c.2.s8 %v121_v52  ;;  %v504_v61 = vunpack.c.2.s8 %v144_v23 }
 0x14d   :  { %v1223_v37 = vpack.c.bf16 %v953_v4, %v863_v43  ;;  %v772_v47 = vcvt.s32.f32 %v322_v15  ;;  %v773_v51 = vcvt.s32.f32 %v323_v20  ;;  %v684_v52 = vcvt.s32.f32 %v234_v35  ;;  %v1873_v58 = vpop.f32.mrf.mxu0  ;;  %v76_v4 = vld [vmem:[#allocation5 + $0x78] sm:$0xff]  ;;  %v1419_v15 = vld [vmem:[#allocation1 + $0x9] sm:$0xff] }
 0x14e   :  { %v1314_v0 = vpack.c.bf16 %v1044_v17, %v1044_v17  ;;  %v1315_v42 = vpack.c.bf16 %v1045_v31, %v1045_v31  ;;  %v864_v6 = vcvt.s32.f32 %v414_v59  ;;  %v954_v7 = vcvt.s32.f32 %v504_v61  ;;  %v1886_v59 = vpop.f32.mrf.mxu1 }
 0x14f   :  { %v1885_v23 = vadd.f32 %v1884_v40, %v1872_v45  ;;  %v416_v60 = vunpack.c.0.s8 %v122_v25  ;;  %v869_v35 = vcvt.s32.f32 %v419_v1  ;;  %v2957_v40 = vld [vmem:[#allocation1 + $0x36] sm:$0xff]  ;;  %v123_v59 = vld [vmem:[#allocation5 + $0x1e8] sm:$0xff] }
 0x150   :  { %v1224_v28 = vpack.c.bf16 %v954_v7, %v864_v6  ;;  %v99_v6 = vld [vmem:[#allocation5 + $0x12c] sm:$0xff] }
 0x151   :  { %v1898_v34 = vadd.f32 %v1897_v55, %v1885_v23  ;;  %v866_v7 = vcvt.s32.f32 %v416_v60  ;;  %v328_v45 = vunpack.c.2.s8 %v99_v6 }
 0x152   :  { %2232 = vmatpush.bf16.xpose.msrb.mxu0 %v1218_v13  ;;  %2245 = vmatpush.bf16.xpose.msrb.mxu1 %v1219_v14  ;;  %v1860_v13 = vpop.f32.mrf.mxu3  ;;  %v232_v14 = vunpack.c.0.s8 %v75_v48 }
 0x153   :  { %2258 = vmatpush.bf16.xpose.msrb.mxu2 %v1220_v16  ;;  %2271 = vmatpush.bf16.xpose.msrb.mxu3 %v1221_v19  ;;  %v233_v16 = vunpack.c.1.s8 %v75_v48  ;;  %v168_v19 = vld [vmem:[#allocation5 + $0x348] sm:$0xff]  ;;  %v1418_v13 = vld [vmem:[#allocation1] sm:$0xff] }
 0x154   :  { %v596_v41 = vunpack.c.0.s8 %v168_v19  ;;  %v597_v44 = vunpack.c.1.s8 %v168_v19  ;;  %v682_v46 = vcvt.s32.f32 %v232_v14  ;;  %v599_v17 = vunpack.c.3.s8 %v168_v19  ;;  %v1420_v14 = vld [vmem:[#allocation1 + $0x12] sm:$0xff] }
 0x155   :  { %v683_v50 = vcvt.s32.f32 %v233_v16  ;;  %v1421_v16 = vld [vmem:[#allocation1 + $0x1b] sm:$0xff] }
 0x156   :  { %v1132_v31 = vpack.c.bf16 %v772_v47, %v682_v46  ;;  %v1049_v33 = vcvt.s32.f32 %v599_v17  ;;  %v239_v46 = vunpack.c.3.s8 %v76_v4  ;;  %v2959_v47 = vld [vmem:[#allocation1 + $0x2d] sm:$0xff]  ;;  %v1936_v17 = vpop.f32.mrf.mxu1 }
 0x157   :  { %v1133_v24 = vpack.c.bf16 %v773_v51, %v683_v50  ;;  %v2961_v50 = vld [vmem:[#allocation1 + $0x3f] sm:$0xff]  ;;  %v57_v51 = vld [vmem:[#allocation2 + $0x40] sm:$0xff] }
 0x158   :  { %v1319_v43 = vpack.c.bf16 %v1049_v33, %v1049_v33  ;;  %1427 = vst [vmem:[#allocation1] ss:$9 sm:$0xff] %v57_v51  ;;  %v689_v55 = vcvt.s32.f32 %v239_v46 }
 0x15a   :  { %2233 = vmatpush.bf16.xpose.msrb.mxu0 %v1128_v21  ;;  %2246 = vmatpush.bf16.xpose.msrb.mxu1 %v1129_v53  ;;  %v774_v21 = vcvt.s32.f32 %v324_v30  ;;  %v685_v53 = vcvt.s32.f32 %v235_v32  ;;  %v1910_v27 = vpop.f32.mrf.mxu3  ;;  %v1899_v32 = vpop.f32.mrf.mxu2 }
 0x15b   :  { %2259 = vmatpush.bf16.xpose.msrb.mxu2 %v1130_v54  ;;  %2272 = vmatpush.bf16.xpose.msrb.mxu3 %v1131_v22  ;;  %v775_v54 = vcvt.s32.f32 %v325_v38  ;;  %v598_v22 = vunpack.c.2.s8 %v168_v19  ;;  %v326_v38 = vunpack.c.0.s8 %v99_v6  ;;  %v77_v32 = vld [vmem:[#allocation5 + $0x80] sm:$0xff] }
 0x161   :  { %2234 = vmatmul.bf16.vlgmr.msrb.gmra.mxu0 %v2943_v49  ;;  %2247 = vmatmul.bf16.vlgmr.msrb.gmra.mxu1 %v2947_v10  ;;  %v1046_v49 = vcvt.s32.f32 %v596_v41  ;;  %v1047_v10 = vcvt.s32.f32 %v597_v44  ;;  %v327_v41 = vunpack.c.1.s8 %v99_v6  ;;  %v238_v44 = vunpack.c.2.s8 %v76_v4 }
 0x162   :  { %2283 = vmatpush.bf16.xpose.msra.mxu0 %v1312_v26  ;;  %2296 = vmatpush.bf16.xpose.msra.mxu1 %v1313_v18  ;;  %v1134_v26 = vpack.c.bf16 %v774_v21, %v684_v52  ;;  %v1048_v18 = vcvt.s32.f32 %v598_v22  ;;  %v1923_v22 = vpop.f32.mrf.mxu0 }
 0x163   :  { %2309 = vmatpush.bf16.xpose.msra.mxu2 %v1314_v0  ;;  %2322 = vmatpush.bf16.xpose.msra.mxu3 %v1315_v42  ;;  %v1316_v56 = vpack.c.bf16 %v1046_v49, %v1046_v49  ;;  %v1317_v29 = vpack.c.bf16 %v1047_v10, %v1047_v10  ;;  %v418_v0 = vunpack.c.2.s8 %v122_v25  ;;  %v1911_v42 = vadd.f32 %v1910_v27, %v1898_v34 }
 0x164   :  { %2260 = vmatmul.bf16.vlgmr.msrb.gmra.mxu2 %v2945_v5  ;;  %2273 = vmatmul.bf16.vlgmr.msrb.gmra.mxu3 %v2949_v11  ;;  %v145_v5 = vld [vmem:[#allocation5 + $0x294] sm:$0xff]  ;;  %v1135_v11 = vpack.c.bf16 %v775_v54, %v685_v53  ;;  %v1318_v3 = vpack.c.bf16 %v1048_v18, %v1048_v18  ;;  %v329_v53 = vunpack.c.3.s8 %v99_v6  ;;  %v778_v18 = vcvt.s32.f32 %v328_v45 }
 0x165   :  { %v506_v61 = vunpack.c.0.s8 %v145_v5  ;;  %v507_v63 = vunpack.c.1.s8 %v145_v5  ;;  %v508_v48 = vunpack.c.2.s8 %v145_v5  ;;  %v509_v2 = vunpack.c.3.s8 %v145_v5 }
 0x166   :  { %v868_v19 = vcvt.s32.f32 %v418_v0  ;;  %v1924_v25 = vadd.f32 %v1923_v22, %v1911_v42  ;;  %v779_v27 = vcvt.s32.f32 %v329_v53 }
 0x167   :  { %v956_v8 = vcvt.s32.f32 %v506_v61  ;;  %v957_v12 = vcvt.s32.f32 %v507_v63  ;;  %v958_v20 = vcvt.s32.f32 %v508_v48  ;;  %v959_v30 = vcvt.s32.f32 %v509_v2  ;;  %v1949_v48 = vpop.f32.mrf.mxu2 }
 0x168   :  { %v1937_v33 = vadd.f32 %v1936_v17, %v1924_v25  ;;  %v1139_v0 = vpack.c.bf16 %v779_v27, %v689_v55  ;;  %v242_v17 = vunpack.c.2.s8 %v77_v32 }
 0x169   :  { %v1226_v52 = vpack.c.bf16 %v956_v8, %v866_v7  ;;  %v1227_v21 = vpack.c.bf16 %v957_v12, %v867_v9  ;;  %v1228_v23 = vpack.c.bf16 %v958_v20, %v868_v19  ;;  %v1229_v54 = vpack.c.bf16 %v959_v30, %v869_v35  ;;  %v1938_v7 = vpop.f32.mrf.mxu1 }
 0x16a   :  { %2284 = vmatpush.bf16.xpose.msra.mxu0 %v1222_v36  ;;  %2297 = vmatpush.bf16.xpose.msra.mxu1 %v1223_v37  ;;  %v1912_v36 = vpop.f32.mrf.mxu3  ;;  %v236_v37 = vunpack.c.0.s8 %v76_v4  ;;  %v1925_v6 = vpop.f32.mrf.mxu0  ;;  %v420_v8 = vunpack.c.0.s8 %v123_v59  ;;  %v510_v9 = vunpack.c.0.s8 %v146_v62  ;;  %v421_v12 = vunpack.c.1.s8 %v123_v59 }
 0x16b   :  { %2310 = vmatpush.bf16.xpose.msra.mxu2 %v1224_v28  ;;  %2323 = vmatpush.bf16.xpose.msra.mxu3 %v1225_v39  ;;  %v237_v28 = vunpack.c.1.s8 %v76_v4  ;;  %v169_v39 = vld [vmem:[#allocation5 + $0x350] sm:$0xff]  ;;  %v1950_v4 = vadd.f32 %v1949_v48, %v1937_v33  ;;  %v423_v19 = vunpack.c.3.s8 %v123_v59  ;;  %v513_v20 = vunpack.c.3.s8 %v146_v62 }
 0x16c   :  { %v600_v49 = vunpack.c.0.s8 %v169_v39  ;;  %v601_v10 = vunpack.c.1.s8 %v169_v39  ;;  %v100_v36 = vld [vmem:[#allocation5 + $0x134] sm:$0xff] }
 0x16d   :  { %v687_v5 = vcvt.s32.f32 %v237_v28  ;;  %v871_v28 = vcvt.s32.f32 %v421_v12  ;;  %v873_v45 = vcvt.s32.f32 %v423_v19  ;;  %v963_v46 = vcvt.s32.f32 %v513_v20  ;;  %v124_v48 = vld [vmem:[#allocation5 + $0x1f0] sm:$0xff] }
 0x16e   :  { %v1050_v34 = vcvt.s32.f32 %v600_v49  ;;  %v1051_v58 = vcvt.s32.f32 %v601_v10  ;;  %v330_v53 = vunpack.c.0.s8 %v100_v36  ;;  %v331_v22 = vunpack.c.1.s8 %v100_v36 }
 0x16f   :  { %v1951_v51 = vpop.f32.mrf.mxu2  ;;  %v332_v49 = vunpack.c.2.s8 %v100_v36  ;;  %v243_v10 = vunpack.c.3.s8 %v77_v32  ;;  %v425_v19 = vunpack.c.1.s8 %v124_v48 }
 0x172   :  { %2285 = vmatpush.bf16.xpose.msra.mxu0 %v1132_v31  ;;  %2298 = vmatpush.bf16.xpose.msra.mxu1 %v1133_v24  ;;  %v686_v31 = vcvt.s32.f32 %v236_v37  ;;  %v776_v24 = vcvt.s32.f32 %v326_v38  ;;  %v1962_v2 = vpop.f32.mrf.mxu3  ;;  %v870_v37 = vcvt.s32.f32 %v420_v8  ;;  %v960_v38 = vcvt.s32.f32 %v510_v9 }
 0x173   :  { %2311 = vmatpush.bf16.xpose.msra.mxu2 %v1134_v26  ;;  %2324 = vmatpush.bf16.xpose.msra.mxu3 %v1135_v11  ;;  %v777_v26 = vcvt.s32.f32 %v327_v41  ;;  %v688_v11 = vcvt.s32.f32 %v238_v44 }
 0x174   :  { %v1136_v60 = vpack.c.bf16 %v776_v24, %v686_v31  ;;  %v1230_v25 = vpack.c.bf16 %v960_v38, %v870_v37  ;;  %v333_v24 = vunpack.c.3.s8 %v100_v36  ;;  %v427_v36 = vunpack.c.3.s8 %v124_v48 }
 0x175   :  { %v1137_v61 = vpack.c.bf16 %v777_v26, %v687_v5  ;;  %v1138_v63 = vpack.c.bf16 %v778_v18, %v688_v11  ;;  %v1233_v26 = vpack.c.bf16 %v963_v46, %v873_v45  ;;  %v1975_v11 = vpop.f32.mrf.mxu0  ;;  %v1988_v18 = vpop.f32.mrf.mxu1  ;;  %v875_v46 = vcvt.s32.f32 %v425_v19  ;;  %v148_v19 = vld [vmem:[#allocation5 + $0x2ac] sm:$0xff] }
 0x179   :  { %2286 = vmatmul.bf16.vlgmr.msra.gmra.mxu0 %v1418_v13  ;;  %2299 = vmatmul.bf16.vlgmr.msra.gmra.mxu1 %v1419_v15  ;;  %v511_v13 = vunpack.c.1.s8 %v146_v62  ;;  %v1963_v15 = vadd.f32 %v1962_v2, %v1950_v4  ;;  %v2001_v4 = vpop.f32.mrf.mxu2 }
 0x17a   :  { %2335 = vmatpush.bf16.xpose.msrb.mxu0 %v1316_v56  ;;  %2348 = vmatpush.bf16.xpose.msrb.mxu1 %v1317_v29  ;;  %v602_v56 = vunpack.c.2.s8 %v169_v39  ;;  %v603_v29 = vunpack.c.3.s8 %v169_v39 }
 0x17b   :  { %2361 = vmatpush.bf16.xpose.msrb.mxu2 %v1318_v3  ;;  %2374 = vmatpush.bf16.xpose.msrb.mxu3 %v1319_v43  ;;  %v1320_v3 = vpack.c.bf16 %v1050_v34, %v1050_v34  ;;  %v1321_v43 = vpack.c.bf16 %v1051_v58, %v1051_v58  ;;  %v961_v39 = vcvt.s32.f32 %v511_v13  ;;  %v1976_v27 = vadd.f32 %v1975_v11, %v1963_v15  ;;  %v2967_v11 = vld [vmem:[#allocation1 + $0x24] sm:$0xff] }
 0x17c   :  { %2312 = vmatmul.bf16.vlgmr.msra.gmra.mxu2 %v1420_v14  ;;  %2325 = vmatmul.bf16.vlgmr.msra.gmra.mxu3 %v1421_v16  ;;  %v1052_v42 = vcvt.s32.f32 %v602_v56  ;;  %v1053_v1 = vcvt.s32.f32 %v603_v29  ;;  %v422_v14 = vunpack.c.2.s8 %v123_v59  ;;  %v512_v16 = vunpack.c.2.s8 %v146_v62 }
 0x17d   :  { %v1231_v31 = vpack.c.bf16 %v961_v39, %v871_v28  ;;  %v780_v29 = vcvt.s32.f32 %v330_v53  ;;  %v781_v58 = vcvt.s32.f32 %v331_v22  ;;  %v692_v59 = vcvt.s32.f32 %v242_v17  ;;  %v1977_v13 = vpop.f32.mrf.mxu0  ;;  %v78_v39 = vld [vmem:[#allocation5 + $0x88] sm:$0xff]  ;;  %v1430_v53 = vld [vmem:[#allocation1 + $0x12] sm:$0xff] }
 0x17e   :  { %v1322_v35 = vpack.c.bf16 %v1052_v42, %v1052_v42  ;;  %v1323_v30 = vpack.c.bf16 %v1053_v1, %v1053_v1  ;;  %v872_v41 = vcvt.s32.f32 %v422_v14  ;;  %v962_v44 = vcvt.s32.f32 %v512_v16  ;;  %v1990_v14 = vpop.f32.mrf.mxu1 }
 0x17f   :  { %v1989_v62 = vadd.f32 %v1988_v18, %v1976_v27  ;;  %v424_v15 = vunpack.c.0.s8 %v124_v48  ;;  %v877_v17 = vcvt.s32.f32 %v427_v36  ;;  %v2969_v18 = vld [vmem:[#allocation1 + $0x2d] sm:$0xff]  ;;  %v125_v14 = vld [vmem:[#allocation5 + $0x1f8] sm:$0xff] }
 0x180   :  { %v1232_v5 = vpack.c.bf16 %v962_v44, %v872_v41  ;;  %v101_v41 = vld [vmem:[#allocation5 + $0x13c] sm:$0xff] }
 0x181   :  { %v2002_v12 = vadd.f32 %v2001_v4, %v1989_v62  ;;  %v874_v44 = vcvt.s32.f32 %v424_v15  ;;  %v336_v27 = vunpack.c.2.s8 %v101_v41 }
 0x182   :  { %2336 = vmatpush.bf16.xpose.msrb.mxu0 %v1226_v52  ;;  %2349 = vmatpush.bf16.xpose.msrb.mxu1 %v1227_v21  ;;  %v1964_v52 = vpop.f32.mrf.mxu3  ;;  %v240_v21 = vunpack.c.0.s8 %v77_v32 }
 0x183   :  { %2362 = vmatpush.bf16.xpose.msrb.mxu2 %v1228_v23  ;;  %2375 = vmatpush.bf16.xpose.msrb.mxu3 %v1229_v54  ;;  %v241_v23 = vunpack.c.1.s8 %v77_v32  ;;  %v170_v54 = vld [vmem:[#allocation5 + $0x358] sm:$0xff] }
 0x184   :  { %v604_v55 = vunpack.c.0.s8 %v170_v54  ;;  %v605_v33 = vunpack.c.1.s8 %v170_v54  ;;  %v690_v56 = vcvt.s32.f32 %v240_v21  ;;  %v607_v42 = vunpack.c.3.s8 %v170_v54  ;;  %v1428_v52 = vld [vmem:[#allocation1] sm:$0xff]  ;;  %v1429_v21 = vld [vmem:[#allocation1 + $0x9] sm:$0xff] }
 0x185   :  { %v691_v34 = vcvt.s32.f32 %v241_v23  ;;  %v1431_v23 = vld [vmem:[#allocation1 + $0x1b] sm:$0xff] }
 0x186   :  { %v1140_v1 = vpack.c.bf16 %v780_v29, %v690_v56  ;;  %v1057_v6 = vcvt.s32.f32 %v607_v42  ;;  %v247_v56 = vunpack.c.3.s8 %v78_v39  ;;  %v2971_v29 = vld [vmem:[#allocation1 + $0x36] sm:$0xff]  ;;  %v2040_v42 = vpop.f32.mrf.mxu1 }
 0x187   :  { %v1141_v2 = vpack.c.bf16 %v781_v58, %v691_v34  ;;  %v2973_v34 = vld [vmem:[#allocation1 + $0x3f] sm:$0xff]  ;;  %v58_v58 = vld [vmem:[#allocation2 + $0x48] sm:$0xff] }
 0x188   :  { %v1327_v28 = vpack.c.bf16 %v1057_v6, %v1057_v6  ;;  %1437 = vst [vmem:[#allocation1] ss:$9 sm:$0xff] %v58_v58  ;;  %v697_v4 = vcvt.s32.f32 %v247_v56 }
 0x18a   :  { %2337 = vmatpush.bf16.xpose.msrb.mxu0 %v1136_v60  ;;  %2350 = vmatpush.bf16.xpose.msrb.mxu1 %v1137_v61  ;;  %v782_v60 = vcvt.s32.f32 %v332_v49  ;;  %v693_v61 = vcvt.s32.f32 %v243_v10  ;;  %v2014_v7 = vpop.f32.mrf.mxu3  ;;  %v2003_v10 = vpop.f32.mrf.mxu2 }
 0x18b   :  { %2363 = vmatpush.bf16.xpose.msrb.mxu2 %v1138_v63  ;;  %2376 = vmatpush.bf16.xpose.msrb.mxu3 %v1139_v0  ;;  %v783_v63 = vcvt.s32.f32 %v333_v24  ;;  %v606_v0 = vunpack.c.2.s8 %v170_v54  ;;  %v334_v24 = vunpack.c.0.s8 %v101_v41  ;;  %v79_v10 = vld [vmem:[#allocation5 + $0x90] sm:$0xff] }
 0x191   :  { %2338 = vmatmul.bf16.vlgmr.msrb.gmra.mxu0 %v2955_v57  ;;  %2351 = vmatmul.bf16.vlgmr.msrb.gmra.mxu1 %v2959_v47  ;;  %v1054_v57 = vcvt.s32.f32 %v604_v55  ;;  %v1055_v47 = vcvt.s32.f32 %v605_v33  ;;  %v335_v55 = vunpack.c.1.s8 %v101_v41  ;;  %v246_v33 = vunpack.c.2.s8 %v78_v39 }
 0x192   :  { %2387 = vmatpush.bf16.xpose.msra.mxu0 %v1320_v3  ;;  %2400 = vmatpush.bf16.xpose.msra.mxu1 %v1321_v43  ;;  %v1142_v3 = vpack.c.bf16 %v782_v60, %v692_v59  ;;  %v1056_v43 = vcvt.s32.f32 %v606_v0  ;;  %v2027_v0 = vpop.f32.mrf.mxu0 }
 0x193   :  { %2413 = vmatpush.bf16.xpose.msra.mxu2 %v1322_v35  ;;  %2426 = vmatpush.bf16.xpose.msra.mxu3 %v1323_v30  ;;  %v1324_v8 = vpack.c.bf16 %v1054_v57, %v1054_v57  ;;  %v1325_v9 = vpack.c.bf16 %v1055_v47, %v1055_v47  ;;  %v426_v35 = vunpack.c.2.s8 %v124_v48  ;;  %v2015_v30 = vadd.f32 %v2014_v7, %v2002_v12 }
 0x194   :  { %2364 = vmatmul.bf16.vlgmr.msrb.gmra.mxu2 %v2957_v40  ;;  %2377 = vmatmul.bf16.vlgmr.msrb.gmra.mxu3 %v2961_v50  ;;  %v147_v40 = vld [vmem:[#allocation5 + $0x2a4] sm:$0xff]  ;;  %v1143_v50 = vpack.c.bf16 %v783_v63, %v693_v61  ;;  %v1326_v38 = vpack.c.bf16 %v1056_v43, %v1056_v43  ;;  %v337_v61 = vunpack.c.3.s8 %v101_v41  ;;  %v786_v43 = vcvt.s32.f32 %v336_v27 }
 0x195   :  { %v514_v16 = vunpack.c.0.s8 %v147_v40  ;;  %v515_v20 = vunpack.c.1.s8 %v147_v40  ;;  %v516_v32 = vunpack.c.2.s8 %v147_v40  ;;  %v517_v37 = vunpack.c.3.s8 %v147_v40 }
 0x196   :  { %v876_v54 = vcvt.s32.f32 %v426_v35  ;;  %v2028_v48 = vadd.f32 %v2027_v0, %v2015_v30  ;;  %v787_v7 = vcvt.s32.f32 %v337_v61 }
 0x197   :  { %v964_v45 = vcvt.s32.f32 %v514_v16  ;;  %v965_v51 = vcvt.s32.f32 %v515_v20  ;;  %v966_v22 = vcvt.s32.f32 %v516_v32  ;;  %v967_v49 = vcvt.s32.f32 %v517_v37  ;;  %v2053_v32 = vpop.f32.mrf.mxu2 }
 0x198   :  { %v2041_v6 = vadd.f32 %v2040_v42, %v2028_v48  ;;  %v1147_v35 = vpack.c.bf16 %v787_v7, %v697_v4  ;;  %v250_v42 = vunpack.c.2.s8 %v79_v10 }
 0x199   :  { %v1234_v59 = vpack.c.bf16 %v964_v45, %v874_v44  ;;  %v1235_v60 = vpack.c.bf16 %v965_v51, %v875_v46  ;;  %v1236_v62 = vpack.c.bf16 %v966_v22, %v876_v54  ;;  %v1237_v63 = vpack.c.bf16 %v967_v49, %v877_v17  ;;  %v2042_v44 = vpop.f32.mrf.mxu1 }
 0x19a   :  { %2388 = vmatpush.bf16.xpose.msra.mxu0 %v1230_v25  ;;  %2401 = vmatpush.bf16.xpose.msra.mxu1 %v1231_v31  ;;  %v2016_v25 = vpop.f32.mrf.mxu3  ;;  %v244_v31 = vunpack.c.0.s8 %v78_v39  ;;  %v2029_v41 = vpop.f32.mrf.mxu0  ;;  %v428_v45 = vunpack.c.0.s8 %v125_v14  ;;  %v518_v46 = vunpack.c.0.s8 %v148_v19  ;;  %v429_v51 = vunpack.c.1.s8 %v125_v14 }
 0x19b   :  { %2414 = vmatpush.bf16.xpose.msra.mxu2 %v1232_v5  ;;  %2427 = vmatpush.bf16.xpose.msra.mxu3 %v1233_v26  ;;  %v245_v5 = vunpack.c.1.s8 %v78_v39  ;;  %v171_v26 = vld [vmem:[#allocation5 + $0x360] sm:$0xff]  ;;  %v2054_v39 = vadd.f32 %v2053_v32, %v2041_v6  ;;  %v431_v54 = vunpack.c.3.s8 %v125_v14  ;;  %v521_v22 = vunpack.c.3.s8 %v148_v19 }
 0x19c   :  { %v608_v57 = vunpack.c.0.s8 %v171_v26  ;;  %v609_v47 = vunpack.c.1.s8 %v171_v26  ;;  %v102_v25 = vld [vmem:[#allocation5 + $0x144] sm:$0xff] }
 0x19d   :  { %v695_v40 = vcvt.s32.f32 %v245_v5  ;;  %v879_v5 = vcvt.s32.f32 %v429_v51  ;;  %v881_v27 = vcvt.s32.f32 %v431_v54  ;;  %v971_v56 = vcvt.s32.f32 %v521_v22  ;;  %v126_v32 = vld [vmem:[#allocation5 + $0x200] sm:$0xff] }
 0x19e   :  { %v1058_v12 = vcvt.s32.f32 %v608_v57  ;;  %v1059_v13 = vcvt.s32.f32 %v609_v47  ;;  %v338_v61 = vunpack.c.0.s8 %v102_v25  ;;  %v339_v0 = vunpack.c.1.s8 %v102_v25 }
 0x19f   :  { %v2055_v58 = vpop.f32.mrf.mxu2  ;;  %v340_v57 = vunpack.c.2.s8 %v102_v25  ;;  %v251_v47 = vunpack.c.3.s8 %v79_v10  ;;  %v433_v54 = vunpack.c.1.s8 %v126_v32 }
 0x1a2   :  { %2389 = vmatpush.bf16.xpose.msra.mxu0 %v1140_v1  ;;  %2402 = vmatpush.bf16.xpose.msra.mxu1 %v1141_v2  ;;  %v694_v1 = vcvt.s32.f32 %v244_v31  ;;  %v784_v2 = vcvt.s32.f32 %v334_v24  ;;  %v2066_v37 = vpop.f32.mrf.mxu3  ;;  %v878_v31 = vcvt.s32.f32 %v428_v45  ;;  %v968_v24 = vcvt.s32.f32 %v518_v46 }
 0x1a3   :  { %2415 = vmatpush.bf16.xpose.msra.mxu2 %v1142_v3  ;;  %2428 = vmatpush.bf16.xpose.msra.mxu3 %v1143_v50  ;;  %v785_v3 = vcvt.s32.f32 %v335_v55  ;;  %v696_v50 = vcvt.s32.f32 %v246_v33 }
 0x1a4   :  { %v1144_v15 = vpack.c.bf16 %v784_v2, %v694_v1  ;;  %v1238_v48 = vpack.c.bf16 %v968_v24, %v878_v31  ;;  %v341_v2 = vunpack.c.3.s8 %v102_v25  ;;  %v435_v25 = vunpack.c.3.s8 %v126_v32 }
 0x1a5   :  { %v1145_v16 = vpack.c.bf16 %v785_v3, %v695_v40  ;;  %v1146_v20 = vpack.c.bf16 %v786_v43, %v696_v50  ;;  %v1241_v3 = vpack.c.bf16 %v971_v56, %v881_v27  ;;  %v2079_v50 = vpop.f32.mrf.mxu0  ;;  %v2092_v43 = vpop.f32.mrf.mxu1  ;;  %v883_v56 = vcvt.s32.f32 %v433_v54 }
 0x1a9   :  { %2390 = vmatmul.bf16.vlgmr.msra.gmra.mxu0 %v1428_v52  ;;  %2403 = vmatmul.bf16.vlgmr.msra.gmra.mxu1 %v1429_v21  ;;  %v519_v52 = vunpack.c.1.s8 %v148_v19  ;;  %v430_v21 = vunpack.c.2.s8 %v125_v14  ;;  %v700_v14 = vcvt.s32.f32 %v250_v42  ;;  %v885_v42 = vcvt.s32.f32 %v435_v25 }
 0x1aa   :  { %2439 = vmatpush.bf16.xpose.msrb.mxu0 %v1324_v8  ;;  %2452 = vmatpush.bf16.xpose.msrb.mxu1 %v1325_v9  ;;  %v610_v8 = vunpack.c.2.s8 %v171_v26  ;;  %v611_v9 = vunpack.c.3.s8 %v171_v26 }
 0x1ab   :  { %2465 = vmatpush.bf16.xpose.msrb.mxu2 %v1326_v38  ;;  %2478 = vmatpush.bf16.xpose.msrb.mxu3 %v1327_v28  ;;  %v1328_v38 = vpack.c.bf16 %v1058_v12, %v1058_v12  ;;  %v1329_v28 = vpack.c.bf16 %v1059_v13, %v1059_v13  ;;  %v969_v26 = vcvt.s32.f32 %v519_v52  ;;  %v880_v55 = vcvt.s32.f32 %v430_v21 }
 0x1ac   :  { %2416 = vmatmul.bf16.vlgmr.msra.gmra.mxu2 %v1430_v53  ;;  %2429 = vmatmul.bf16.vlgmr.msra.gmra.mxu3 %v1431_v23  ;;  %v1060_v30 = vcvt.s32.f32 %v610_v8  ;;  %v1061_v36 = vcvt.s32.f32 %v611_v9  ;;  %v2067_v53 = vadd.f32 %v2066_v37, %v2054_v39  ;;  %v520_v23 = vunpack.c.2.s8 %v148_v19  ;;  %v2105_v39 = vpop.f32.mrf.mxu2 }
 0x1ad   :  { %v1239_v1 = vpack.c.bf16 %v969_v26, %v879_v5  ;;  %v788_v9 = vcvt.s32.f32 %v338_v61  ;;  %v789_v13 = vcvt.s32.f32 %v339_v0  ;;  %v2081_v52 = vpop.f32.mrf.mxu0  ;;  %v2094_v21 = vpop.f32.mrf.mxu1  ;;  %v80_v26 = vld [vmem:[#allocation5 + $0x98] sm:$0xff]  ;;  %v1439_v61 = vld [vmem:[#allocation1 + $0x9] sm:$0xff] }
 0x1ae   :  { %v1330_v17 = vpack.c.bf16 %v1060_v30, %v1060_v30  ;;  %v1331_v49 = vpack.c.bf16 %v1061_v36, %v1061_v36  ;;  %v970_v33 = vcvt.s32.f32 %v520_v23  ;;  %v2080_v7 = vadd.f32 %v2079_v50, %v2067_v53  ;;  %v2979_v50 = vld [vmem:[#allocation1 + $0x24] sm:$0xff] }
 0x1af   :  { %v432_v53 = vunpack.c.0.s8 %v126_v32  ;;  %v127_v21 = vld [vmem:[#allocation5 + $0x208] sm:$0xff] }
 0x1b0   :  { %v1240_v40 = vpack.c.bf16 %v970_v33, %v880_v55  ;;  %v2093_v19 = vadd.f32 %v2092_v43, %v2080_v7  ;;  %v103_v33 = vld [vmem:[#allocation5 + $0x14c] sm:$0xff] }
 0x1b1   :  { %v882_v55 = vcvt.s32.f32 %v432_v53  ;;  %v2981_v43 = vld [vmem:[#allocation1 + $0x2d] sm:$0xff]  ;;  %v344_v7 = vunpack.c.2.s8 %v103_v33  ;;  %v150_v53 = vld [vmem:[#allocation5 + $0x2bc] sm:$0xff] }
 0x1b2   :  { %2440 = vmatpush.bf16.xpose.msrb.mxu0 %v1234_v59  ;;  %2453 = vmatpush.bf16.xpose.msrb.mxu1 %v1235_v60  ;;  %v2068_v59 = vpop.f32.mrf.mxu3  ;;  %v248_v60 = vunpack.c.0.s8 %v79_v10  ;;  %v2106_v51 = vadd.f32 %v2105_v39, %v2093_v19 }
 0x1b3   :  { %2466 = vmatpush.bf16.xpose.msrb.mxu2 %v1236_v62  ;;  %2479 = vmatpush.bf16.xpose.msrb.mxu3 %v1237_v63  ;;  %v249_v62 = vunpack.c.1.s8 %v79_v10  ;;  %v172_v63 = vld [vmem:[#allocation5 + $0x368] sm:$0xff] }
 0x1b4   :  { %v612_v4 = vunpack.c.0.s8 %v172_v63  ;;  %v613_v6 = vunpack.c.1.s8 %v172_v63  ;;  %v698_v8 = vcvt.s32.f32 %v248_v60  ;;  %v615_v30 = vunpack.c.3.s8 %v172_v63  ;;  %v1438_v60 = vld [vmem:[#allocation1] sm:$0xff] }
 0x1b5   :  { %v699_v12 = vcvt.s32.f32 %v249_v62  ;;  %v1440_v62 = vld [vmem:[#allocation1 + $0x12] sm:$0xff] }
 0x1b6   :  { %v1148_v36 = vpack.c.bf16 %v788_v9, %v698_v8  ;;  %v1065_v41 = vcvt.s32.f32 %v615_v30  ;;  %v255_v8 = vunpack.c.3.s8 %v80_v26  ;;  %v2983_v9 = vld [vmem:[#allocation1 + $0x36] sm:$0xff]  ;;  %v2144_v30 = vpop.f32.mrf.mxu1 }
 0x1b7   :  { %v1149_v37 = vpack.c.bf16 %v789_v13, %v699_v12  ;;  %v2985_v12 = vld [vmem:[#allocation1 + $0x3f] sm:$0xff] }
 0x1b8   :  { %v1335_v5 = vpack.c.bf16 %v1065_v41, %v1065_v41  ;;  %v59_v13 = vld [vmem:[#allocation2 + $0x50] sm:$0xff]  ;;  %v705_v39 = vcvt.s32.f32 %v255_v8 }
 0x1b9   :  { %v104_v8 = vld [vmem:[#allocation5 + $0x154] sm:$0xff] }
 0x1ba   :  { %2441 = vmatpush.bf16.xpose.msrb.mxu0 %v1144_v15  ;;  %2454 = vmatpush.bf16.xpose.msrb.mxu1 %v1145_v16  ;;  %v790_v15 = vcvt.s32.f32 %v340_v57  ;;  %v701_v16 = vcvt.s32.f32 %v251_v47  ;;  %v2118_v44 = vpop.f32.mrf.mxu3  ;;  %v252_v47 = vunpack.c.0.s8 %v80_v26 }
 0x1bb   :  { %2467 = vmatpush.bf16.xpose.msrb.mxu2 %v1146_v20  ;;  %2480 = vmatpush.bf16.xpose.msrb.mxu3 %v1147_v35  ;;  %v791_v20 = vcvt.s32.f32 %v341_v2  ;;  %v614_v35 = vunpack.c.2.s8 %v172_v63  ;;  %v1441_v63 = vld [vmem:[#allocation1 + $0x1b] sm:$0xff]  ;;  %v342_v2 = vunpack.c.0.s8 %v103_v33 }
 0x1bc   :  { %1447 = vst [vmem:[#allocation1] ss:$9 sm:$0xff] %v59_v13 }
 0x1c1   :  { %2442 = vmatmul.bf16.vlgmr.msrb.gmra.mxu0 %v2967_v11  ;;  %2455 = vmatmul.bf16.vlgmr.msrb.gmra.mxu1 %v2969_v18  ;;  %v1062_v11 = vcvt.s32.f32 %v612_v4  ;;  %v1063_v18 = vcvt.s32.f32 %v613_v6  ;;  %v343_v4 = vunpack.c.1.s8 %v103_v33  ;;  %v254_v6 = vunpack.c.2.s8 %v80_v26 }
 0x1c2   :  { %2491 = vmatpush.bf16.xpose.msra.mxu0 %v1328_v38  ;;  %2504 = vmatpush.bf16.xpose.msra.mxu1 %v1329_v28  ;;  %v1150_v38 = vpack.c.bf16 %v790_v15, %v700_v14  ;;  %v1064_v28 = vcvt.s32.f32 %v614_v35  ;;  %v2131_v35 = vpop.f32.mrf.mxu0 }
 0x1c3   :  { %2517 = vmatpush.bf16.xpose.msra.mxu2 %v1330_v17  ;;  %2530 = vmatpush.bf16.xpose.msra.mxu3 %v1331_v49  ;;  %v1332_v45 = vpack.c.bf16 %v1062_v11, %v1062_v11  ;;  %v1333_v46 = vpack.c.bf16 %v1063_v18, %v1063_v18  ;;  %v434_v17 = vunpack.c.2.s8 %v126_v32  ;;  %v2119_v49 = vadd.f32 %v2118_v44, %v2106_v51 }
 0x1c4   :  { %2468 = vmatmul.bf16.vlgmr.msrb.gmra.mxu2 %v2971_v29  ;;  %2481 = vmatmul.bf16.vlgmr.msrb.gmra.mxu3 %v2973_v34  ;;  %v149_v29 = vld [vmem:[#allocation5 + $0x2b4] sm:$0xff]  ;;  %v1151_v34 = vpack.c.bf16 %v791_v20, %v701_v16  ;;  %v1334_v24 = vpack.c.bf16 %v1064_v28, %v1064_v28  ;;  %v345_v16 = vunpack.c.3.s8 %v103_v33  ;;  %v702_v11 = vcvt.s32.f32 %v252_v47 }
 0x1c5   :  { %v522_v23 = vunpack.c.0.s8 %v149_v29  ;;  %v523_v22 = vunpack.c.1.s8 %v149_v29  ;;  %v524_v10 = vunpack.c.2.s8 %v149_v29  ;;  %v525_v31 = vunpack.c.3.s8 %v149_v29 }
 0x1c6   :  { %v884_v59 = vcvt.s32.f32 %v434_v17  ;;  %v2132_v32 = vadd.f32 %v2131_v35, %v2119_v49  ;;  %v794_v28 = vcvt.s32.f32 %v344_v7  ;;  %v795_v44 = vcvt.s32.f32 %v345_v16 }
 0x1c7   :  { %v972_v27 = vcvt.s32.f32 %v522_v23  ;;  %v973_v58 = vcvt.s32.f32 %v523_v22  ;;  %v974_v0 = vcvt.s32.f32 %v524_v10  ;;  %v975_v57 = vcvt.s32.f32 %v525_v31 }
 0x1c8   :  { %v2145_v41 = vadd.f32 %v2144_v30, %v2132_v32  ;;  %v1155_v17 = vpack.c.bf16 %v795_v44, %v705_v39  ;;  %v436_v33 = vunpack.c.0.s8 %v127_v21  ;;  %v346_v35 = vunpack.c.0.s8 %v104_v8 }
 0x1c9   :  { %v1242_v14 = vpack.c.bf16 %v972_v27, %v882_v55  ;;  %v1243_v15 = vpack.c.bf16 %v973_v58, %v883_v56  ;;  %v1244_v19 = vpack.c.bf16 %v974_v0, %v884_v59  ;;  %v1245_v20 = vpack.c.bf16 %v975_v57, %v885_v42  ;;  %v2146_v55 = vpop.f32.mrf.mxu1 }
 0x1ca   :  { %2492 = vmatpush.bf16.xpose.msra.mxu0 %v1238_v48  ;;  %2505 = vmatpush.bf16.xpose.msra.mxu1 %v1239_v1  ;;  %v2107_v48 = vpop.f32.mrf.mxu2  ;;  %v2120_v1 = vpop.f32.mrf.mxu3  ;;  %v526_v27 = vunpack.c.0.s8 %v150_v53  ;;  %v437_v58 = vunpack.c.1.s8 %v127_v21  ;;  %v527_v59 = vunpack.c.1.s8 %v150_v53  ;;  %v529_v0 = vunpack.c.3.s8 %v150_v53 }
 0x1cb   :  { %2518 = vmatpush.bf16.xpose.msra.mxu2 %v1240_v40  ;;  %2531 = vmatpush.bf16.xpose.msra.mxu3 %v1241_v3  ;;  %v253_v40 = vunpack.c.1.s8 %v80_v26  ;;  %v173_v3 = vld [vmem:[#allocation5 + $0x370] sm:$0xff]  ;;  %v2133_v26 = vpop.f32.mrf.mxu0  ;;  %v886_v47 = vcvt.s32.f32 %v436_v33  ;;  %v349_v39 = vunpack.c.3.s8 %v104_v8 }
 0x1cc   :  { %v616_v18 = vunpack.c.0.s8 %v173_v3  ;;  %v617_v29 = vunpack.c.1.s8 %v173_v3  ;;  %v976_v48 = vcvt.s32.f32 %v526_v27  ;;  %v887_v1 = vcvt.s32.f32 %v437_v58 }
 0x1cd   :  { %v979_v7 = vcvt.s32.f32 %v529_v0 }
 0x1ce   :  { %v1066_v51 = vcvt.s32.f32 %v616_v18  ;;  %v1067_v52 = vcvt.s32.f32 %v617_v29 }
 0x1d0   :  { %v1337_v56 = vpack.c.bf16 %v1067_v52, %v1067_v52 }
 0x1d2   :  { %2493 = vmatpush.bf16.xpose.msra.mxu0 %v1148_v36  ;;  %2506 = vmatpush.bf16.xpose.msra.mxu1 %v1149_v37  ;;  %v792_v36 = vcvt.s32.f32 %v342_v2  ;;  %v703_v37 = vcvt.s32.f32 %v253_v40  ;;  %v2157_v10 = vpop.f32.mrf.mxu2  ;;  %v2170_v31 = vpop.f32.mrf.mxu3  ;;  %v977_v2 = vcvt.s32.f32 %v527_v59  ;;  %v81_v40 = vld [vmem:[#allocation5 + $0xa0] sm:$0xff] }
 0x1d3   :  { %2519 = vmatpush.bf16.xpose.msra.mxu2 %v1150_v38  ;;  %2532 = vmatpush.bf16.xpose.msra.mxu3 %v1151_v34  ;;  %v793_v38 = vcvt.s32.f32 %v343_v4  ;;  %v704_v34 = vcvt.s32.f32 %v254_v6  ;;  %v256_v16 = vunpack.c.0.s8 %v81_v40  ;;  %v257_v30 = vunpack.c.1.s8 %v81_v40 }
 0x1d4   :  { %v1152_v23 = vpack.c.bf16 %v792_v36, %v702_v11  ;;  %v347_v11 = vunpack.c.1.s8 %v104_v8  ;;  %v2183_v36 = vpop.f32.mrf.mxu0  ;;  %v258_v29 = vunpack.c.2.s8 %v81_v40 }
 0x1d5   :  { %v1153_v54 = vpack.c.bf16 %v793_v38, %v703_v37  ;;  %v1154_v22 = vpack.c.bf16 %v794_v28, %v704_v34  ;;  %v2196_v37 = vpop.f32.mrf.mxu1  ;;  %v348_v38 = vunpack.c.2.s8 %v104_v8  ;;  %v259_v28 = vunpack.c.3.s8 %v81_v40 }
 0x1d6   :  { %v706_v44 = vcvt.s32.f32 %v256_v16 }
 0x1d9   :  { %2494 = vmatmul.bf16.vlgmr.msra.gmra.mxu0 %v1438_v60  ;;  %2507 = vmatmul.bf16.vlgmr.msra.gmra.mxu1 %v1439_v61  ;;  %v438_v60 = vunpack.c.2.s8 %v127_v21 }
 0x1da   :  { %2543 = vmatpush.bf16.xpose.msrb.mxu0 %v1332_v45  ;;  %2556 = vmatpush.bf16.xpose.msrb.mxu1 %v1333_v46  ;;  %v618_v45 = vunpack.c.2.s8 %v173_v3  ;;  %v619_v46 = vunpack.c.3.s8 %v173_v3  ;;  %v2159_v13 = vpop.f32.mrf.mxu2 }
 0x1db   :  { %2569 = vmatpush.bf16.xpose.msrb.mxu2 %v1334_v24  ;;  %2582 = vmatpush.bf16.xpose.msrb.mxu3 %v1335_v5  ;;  %v1336_v24 = vpack.c.bf16 %v1066_v51, %v1066_v51  ;;  %v2158_v5 = vadd.f32 %v2157_v10, %v2145_v41  ;;  %v888_v3 = vcvt.s32.f32 %v438_v60 }
 0x1dc   :  { %2520 = vmatmul.bf16.vlgmr.msra.gmra.mxu2 %v1440_v62  ;;  %2533 = vmatmul.bf16.vlgmr.msra.gmra.mxu3 %v1441_v63  ;;  %v1068_v49 = vcvt.s32.f32 %v618_v45  ;;  %v1069_v25 = vcvt.s32.f32 %v619_v46  ;;  %v528_v62 = vunpack.c.2.s8 %v150_v53  ;;  %v439_v63 = vunpack.c.3.s8 %v127_v21  ;;  %v2185_v27 = vpop.f32.mrf.mxu0 }
 0x1dd   :  { %v2171_v61 = vadd.f32 %v2170_v31, %v2158_v5  ;;  %v796_v21 = vcvt.s32.f32 %v346_v35  ;;  %v707_v53 = vcvt.s32.f32 %v257_v30  ;;  %v2993_v35 = vld [vmem:[#allocation1 + $0x2d] sm:$0xff]  ;;  %v2995_v30 = vld [vmem:[#allocation1 + $0x36] sm:$0xff] }
 0x1de   :  { %v1338_v42 = vpack.c.bf16 %v1068_v49, %v1068_v49  ;;  %v1339_v57 = vpack.c.bf16 %v1069_v25, %v1069_v25  ;;  %v978_v4 = vcvt.s32.f32 %v528_v62  ;;  %v889_v6 = vcvt.s32.f32 %v439_v63  ;;  %v151_v49 = vld [vmem:[#allocation5 + $0x2c4] sm:$0xff] }
 0x1df   :  { %v2184_v34 = vadd.f32 %v2183_v36, %v2171_v61  ;;  %v1156_v31 = vpack.c.bf16 %v796_v21, %v706_v44  ;;  %v530_v59 = vunpack.c.0.s8 %v151_v49  ;;  %v531_v63 = vunpack.c.1.s8 %v151_v49 }
 0x1e0   :  { %v1248_v18 = vpack.c.bf16 %v978_v4, %v888_v3  ;;  %v1249_v32 = vpack.c.bf16 %v979_v7, %v889_v6  ;;  %v533_v40 = vunpack.c.3.s8 %v151_v49  ;;  %v1448_v3 = vld [vmem:[#allocation1] sm:$0xff]  ;;  %v1449_v4 = vld [vmem:[#allocation1 + $0x9] sm:$0xff]  ;;  %v1450_v6 = vld [vmem:[#allocation1 + $0x12] sm:$0xff] }
 0x1e1   :  { %v2197_v52 = vadd.f32 %v2196_v37, %v2184_v34  ;;  %v1451_v7 = vld [vmem:[#allocation1 + $0x1b] sm:$0xff]  ;;  %v980_v13 = vcvt.s32.f32 %v530_v59  ;;  %v981_v16 = vcvt.s32.f32 %v531_v63  ;;  %v152_v59 = vld [vmem:[#allocation5 + $0x2cc] sm:$0xf] }
 0x1e2   :  { %2544 = vmatpush.bf16.xpose.msrb.mxu0 %v1242_v14  ;;  %2557 = vmatpush.bf16.xpose.msrb.mxu1 %v1243_v15  ;;  %v2172_v14 = vpop.f32.mrf.mxu3  ;;  %v1246_v15 = vpack.c.bf16 %v976_v48, %v886_v47  ;;  %v2209_v5 = vpop.f32.mrf.mxu2 }
 0x1e3   :  { %2570 = vmatpush.bf16.xpose.msrb.mxu2 %v1244_v19  ;;  %2583 = vmatpush.bf16.xpose.msrb.mxu3 %v1245_v20  ;;  %v174_v19 = vld [vmem:[#allocation5 + $0x378] sm:$0xff]  ;;  %v1247_v20 = vpack.c.bf16 %v977_v2, %v887_v1  ;;  %v2210_v33 = vadd.f32 %v2209_v5, %v2197_v52  ;;  %v532_v1 = vunpack.c.2.s8 %v151_v49  ;;  %v82_v14 = vld [vmem:[#allocation5 + $0xa8] sm:$0xff] }
 0x1e4   :  { %v620_v41 = vunpack.c.0.s8 %v174_v19  ;;  %v621_v45 = vunpack.c.1.s8 %v174_v19  ;;  %v622_v46 = vunpack.c.2.s8 %v174_v19  ;;  %v623_v51 = vunpack.c.3.s8 %v174_v19  ;;  %v105_v19 = vld [vmem:[#allocation5 + $0x15c] sm:$0xff]  ;;  %v2235_v52 = vpop.f32.mrf.mxu0 }
 0x1e5   :  { %v982_v36 = vcvt.s32.f32 %v532_v1  ;;  %v350_v44 = vunpack.c.0.s8 %v105_v19 }
 0x1e6   :  { %v1072_v10 = vcvt.s32.f32 %v622_v46  ;;  %v1073_v25 = vcvt.s32.f32 %v623_v51  ;;  %v351_v46 = vunpack.c.1.s8 %v105_v19  ;;  %v175_v51 = vld [vmem:[#allocation5 + $0x380] sm:$0xf] }
 0x1e7   :  { %v624_v49 = vunpack.c.0.s8 %v175_v51 }
 0x1e9   :  { %v1074_v27 = vcvt.s32.f32 %v624_v49 }
 0x1ea   :  { %2545 = vmatpush.bf16.xpose.msrb.mxu0 %v1152_v23  ;;  %2558 = vmatpush.bf16.xpose.msrb.mxu1 %v1153_v54  ;;  %v797_v23 = vcvt.s32.f32 %v347_v11  ;;  %v709_v54 = vcvt.s32.f32 %v259_v28  ;;  %v2222_v26 = vpop.f32.mrf.mxu3  ;;  %v2997_v11 = vld [vmem:[#allocation1 + $0x3f] sm:$0xff] }
 0x1eb   :  { %2571 = vmatpush.bf16.xpose.msrb.mxu2 %v1154_v22  ;;  %2584 = vmatpush.bf16.xpose.msrb.mxu3 %v1155_v17  ;;  %v799_v22 = vcvt.s32.f32 %v349_v39  ;;  %v1070_v17 = vcvt.s32.f32 %v620_v41  ;;  %v2223_v47 = vadd.f32 %v2222_v26, %v2210_v33  ;;  %v260_v39 = vunpack.c.0.s8 %v82_v14 }
 0x1ed   :  { %v1159_v60 = vpack.c.bf16 %v799_v22, %v709_v54  ;;  %v1340_v61 = vpack.c.bf16 %v1070_v17, %v1070_v17  ;;  %v2236_v17 = vadd.f32 %v2235_v52, %v2223_v47  ;;  %v2237_v47 = vpop.f32.mrf.mxu0 }
 0x1f1   :  { %2546 = vmatmul.bf16.vlgmr.msrb.gmra.mxu0 %v2979_v50  ;;  %2559 = vmatmul.bf16.vlgmr.msrb.gmra.mxu1 %v2981_v43  ;;  %v708_v50 = vcvt.s32.f32 %v258_v29  ;;  %v798_v43 = vcvt.s32.f32 %v348_v38  ;;  %v983_v29 = vcvt.s32.f32 %v533_v40  ;;  %v2211_v38 = vpop.f32.mrf.mxu2 }
 0x1f2   :  { %2595 = vmatpush.bf16.xpose.msra.mxu0 %v1336_v24  ;;  %2608 = vmatpush.bf16.xpose.msra.mxu1 %v1337_v56  ;;  %v1157_v24 = vpack.c.bf16 %v797_v23, %v707_v53  ;;  %v2198_v56 = vpop.f32.mrf.mxu1  ;;  %v2224_v34 = vpop.f32.mrf.mxu3  ;;  %v262_v53 = vunpack.c.2.s8 %v82_v14  ;;  %v352_v23 = vunpack.c.2.s8 %v105_v19 }
 0x1f3   :  { %2621 = vmatpush.bf16.xpose.msra.mxu2 %v1338_v42  ;;  %2634 = vmatpush.bf16.xpose.msra.mxu3 %v1339_v57  ;;  %v1158_v55 = vpack.c.bf16 %v798_v43, %v708_v50  ;;  %v1342_v42 = vpack.c.bf16 %v1072_v10, %v1072_v10  ;;  %v1343_v57 = vpack.c.bf16 %v1073_v25, %v1073_v25  ;;  %v263_v50 = vunpack.c.3.s8 %v82_v14 }
 0x1f4   :  { %2572 = vmatmul.bf16.vlgmr.msrb.gmra.mxu2 %v2983_v9  ;;  %2585 = vmatmul.bf16.vlgmr.msrb.gmra.mxu3 %v2985_v12  ;;  %v128_v9 = vld [vmem:[#allocation5 + $0x210] sm:$0xff]  ;;  %v1071_v12 = vcvt.s32.f32 %v621_v45  ;;  %v261_v45 = vunpack.c.1.s8 %v82_v14  ;;  %v353_v43 = vunpack.c.3.s8 %v105_v19  ;;  %v800_v25 = vcvt.s32.f32 %v350_v44 }
 0x1f5   :  { %v440_v58 = vunpack.c.0.s8 %v128_v9  ;;  %v441_v62 = vunpack.c.1.s8 %v128_v9  ;;  %v442_v48 = vunpack.c.2.s8 %v128_v9  ;;  %v443_v2 = vunpack.c.3.s8 %v128_v9 }
 0x1f6   :  { %v1341_v0 = vpack.c.bf16 %v1071_v12, %v1071_v12  ;;  %v710_v9 = vcvt.s32.f32 %v260_v39  ;;  %v625_v12 = vunpack.c.1.s8 %v175_v51  ;;  %v712_v5 = vcvt.s32.f32 %v262_v53 }
 0x1f7   :  { %v890_v8 = vcvt.s32.f32 %v440_v58  ;;  %v893_v37 = vcvt.s32.f32 %v443_v2  ;;  %v802_v26 = vcvt.s32.f32 %v352_v23  ;;  %v803_v33 = vcvt.s32.f32 %v353_v43  ;;  %v129_v58 = vld [vmem:[#allocation5 + $0x218] sm:$0xf] }
 0x1f8   :  { %v1075_v56 = vcvt.s32.f32 %v625_v12  ;;  %v444_v1 = vunpack.c.0.s8 %v129_v58  ;;  %v534_v2 = vunpack.c.0.s8 %v152_v59  ;;  %v445_v40 = vunpack.c.1.s8 %v129_v58 }
 0x1f9   :  { %v1250_v28 = vpack.c.bf16 %v980_v13, %v890_v8  ;;  %v1253_v22 = vpack.c.bf16 %v983_v29, %v893_v37  ;;  %v2287_v29 = vpop.f32.mrf.mxu0 }
 0x1fa   :  { %2596 = vmatpush.bf16.xpose.msra.mxu0 %v1246_v15  ;;  %2609 = vmatpush.bf16.xpose.msra.mxu1 %v1247_v20  ;;  %v891_v15 = vcvt.s32.f32 %v441_v62  ;;  %v2991_v20 = vld [vmem:[#allocation1 + $0x24] sm:$0xff]  ;;  %v2248_v21 = vpop.f32.mrf.mxu1  ;;  %v2274_v62 = vpop.f32.mrf.mxu3  ;;  %v894_v8 = vcvt.s32.f32 %v444_v1  ;;  %v984_v13 = vcvt.s32.f32 %v534_v2  ;;  %v895_v14 = vcvt.s32.f32 %v445_v40 }
 0x1fb   :  { %2622 = vmatpush.bf16.xpose.msra.mxu2 %v1248_v18  ;;  %2635 = vmatpush.bf16.xpose.msra.mxu3 %v1249_v32  ;;  %v60_v18 = vld [vmem:[#allocation2 + $0x58] sm:$0x3]  ;;  %v892_v32 = vcvt.s32.f32 %v442_v48  ;;  %v2249_v10 = vadd.f32 %v2248_v21, %v2236_v17 }
 0x1fc   :  { %1457 = vst [vmem:[#allocation1] ss:$9 sm:$0xff] %v60_v18  ;;  %v1251_v41 = vpack.c.bf16 %v981_v16, %v891_v15  ;;  %v83_v18 = vld [vmem:[#allocation5 + $0xb0] sm:$0xf] }
 0x1fd   :  { %v1252_v54 = vpack.c.bf16 %v982_v36, %v892_v32  ;;  %v106_v32 = vld [vmem:[#allocation5 + $0x164] sm:$0xf]  ;;  %v1254_v36 = vpack.c.bf16 %v984_v13, %v894_v8  ;;  %v264_v34 = vunpack.c.0.s8 %v83_v18  ;;  %v265_v39 = vunpack.c.1.s8 %v83_v18 }
 0x1ff   :  { %v715_v52 = vcvt.s32.f32 %v265_v39 }
 0x202   :  { %2597 = vmatpush.bf16.xpose.msra.mxu0 %v1156_v31  ;;  %2610 = vmatpush.bf16.xpose.msra.mxu1 %v1157_v24  ;;  %v711_v31 = vcvt.s32.f32 %v261_v45  ;;  %v801_v24 = vcvt.s32.f32 %v351_v46  ;;  %v2250_v48 = vpop.f32.mrf.mxu1  ;;  %v2276_v19 = vpop.f32.mrf.mxu3  ;;  %v714_v46 = vcvt.s32.f32 %v264_v34 }
 0x203   :  { %2623 = vmatpush.bf16.xpose.msra.mxu2 %v1158_v55  ;;  %2636 = vmatpush.bf16.xpose.msra.mxu3 %v1159_v60  ;;  %v713_v55 = vcvt.s32.f32 %v263_v50  ;;  %v1160_v60 = vpack.c.bf16 %v800_v25, %v710_v9  ;;  %v1459_v9 = vld [vmem:[#allocation1 + $0x9] sm:$0xff] }
 0x204   :  { %v1161_v63 = vpack.c.bf16 %v801_v24, %v711_v31 }
 0x209   :  { %2598 = vmatmul.bf16.vlgmr.msra.gmra.mxu0 %v1448_v3  ;;  %2611 = vmatmul.bf16.vlgmr.msra.gmra.mxu1 %v1449_v4  ;;  %v535_v3 = vunpack.c.1.s8 %v152_v59  ;;  %v1344_v4 = vpack.c.bf16 %v1074_v27, %v1074_v27 }
 0x20a   :  { %2647 = vmatpush.bf16.xpose.msrb.mxu0 %v1340_v61  ;;  %2660 = vmatpush.bf16.xpose.msrb.mxu1 %v1341_v0  ;;  %v2261_v61 = vpop.f32.mrf.mxu2  ;;  %v1162_v0 = vpack.c.bf16 %v802_v26, %v712_v5  ;;  %v2300_v38 = vpop.f32.mrf.mxu1 }
 0x20b   :  { %2673 = vmatpush.bf16.xpose.msrb.mxu2 %v1342_v42  ;;  %2686 = vmatpush.bf16.xpose.msrb.mxu3 %v1343_v57  ;;  %v1163_v42 = vpack.c.bf16 %v803_v33, %v713_v55  ;;  %v2262_v57 = vadd.f32 %v2261_v61, %v2249_v10  ;;  %v985_v15 = vcvt.s32.f32 %v535_v3  ;;  %v2326_v23 = vpop.f32.mrf.mxu3 }
 0x20c   :  { %2624 = vmatmul.bf16.vlgmr.msra.gmra.mxu2 %v1450_v6  ;;  %2637 = vmatmul.bf16.vlgmr.msra.gmra.mxu3 %v1451_v7  ;;  %v1345_v6 = vpack.c.bf16 %v1075_v56, %v1075_v56 }
 0x20d   :  { %v2275_v7 = vadd.f32 %v2274_v62, %v2262_v57  ;;  %v1255_v37 = vpack.c.bf16 %v985_v15, %v895_v14 }
 0x20f   :  { %v2288_v44 = vadd.f32 %v2287_v29, %v2275_v7 }
 0x211   :  { %v2301_v45 = vadd.f32 %v2300_v38, %v2288_v44 }
 0x212   :  { %2648 = vmatpush.bf16.xpose.msrb.mxu0 %v1250_v28  ;;  %2661 = vmatpush.bf16.xpose.msrb.mxu1 %v1251_v41  ;;  %v2263_v16 = vpop.f32.mrf.mxu2  ;;  %v354_v28 = vunpack.c.0.s8 %v106_v32  ;;  %v355_v41 = vunpack.c.1.s8 %v106_v32 }
 0x213   :  { %2674 = vmatpush.bf16.xpose.msrb.mxu2 %v1252_v54  ;;  %2687 = vmatpush.bf16.xpose.msrb.mxu3 %v1253_v22  ;;  %v2302_v22 = vpop.f32.mrf.mxu1  ;;  %v2328_v17 = vpop.f32.mrf.mxu3 }
 0x214   :  { %v804_v51 = vcvt.s32.f32 %v354_v28  ;;  %v805_v21 = vcvt.s32.f32 %v355_v41 }
 0x216   :  { %v1164_v50 = vpack.c.bf16 %v804_v51, %v714_v46  ;;  %v1165_v43 = vpack.c.bf16 %v805_v21, %v715_v52 }
 0x21a   :  { %2649 = vmatpush.bf16.xpose.msrb.mxu0 %v1160_v60  ;;  %2662 = vmatpush.bf16.xpose.msrb.mxu1 %v1161_v63  ;;  %v2313_v53 = vpop.f32.mrf.mxu2 }
 0x21b   :  { %2675 = vmatpush.bf16.xpose.msrb.mxu2 %v1162_v0  ;;  %2688 = vmatpush.bf16.xpose.msrb.mxu3 %v1163_v42  ;;  %v2314_v54 = vadd.f32 %v2313_v53, %v2301_v45  ;;  %v2352_v12 = vpop.f32.mrf.mxu1  ;;  %v2378_v24 = vpop.f32.mrf.mxu3 }
 0x221   :  { %2650 = vmatmul.bf16.vlgmr.msrb.gmra.mxu0 %v2991_v20  ;;  %2663 = vmatmul.bf16.vlgmr.msrb.gmra.mxu1 %v2993_v35  ;;  %v2289_v20 = vpop.f32.mrf.mxu0  ;;  %v2327_v35 = vadd.f32 %v2326_v23, %v2314_v54 }
 0x222   :  { %2699 = vmatpush.bf16.xpose.msra.mxu0 %v1344_v4  ;;  %2712 = vmatpush.bf16.xpose.msra.mxu1 %v1345_v6 }
 0x223   :  { %2676 = vmatmul.bf16.vlgmr.msrb.gmra.mxu2 %v2995_v30  ;;  %2689 = vmatmul.bf16.vlgmr.msrb.gmra.mxu3 %v2997_v11  ;;  %v2315_v30 = vpop.f32.mrf.mxu2  ;;  %v1458_v11 = vld [vmem:[#allocation1] sm:$0xff]  ;;  %v2354_v55 = vpop.f32.mrf.mxu1 }
 0x224   :  { %v2380_v56 = vpop.f32.mrf.mxu3 }
 0x229   :  { %v2339_v49 = vpop.f32.mrf.mxu0 }
 0x22a   :  { %2700 = vmatpush.bf16.xpose.msra.mxu0 %v1254_v36  ;;  %2713 = vmatpush.bf16.xpose.msra.mxu1 %v1255_v37  ;;  %v2340_v10 = vadd.f32 %v2339_v49, %v2327_v35 }
 0x22b   :  { %v2365_v31 = vpop.f32.mrf.mxu2  ;;  %v2404_v59 = vpop.f32.mrf.mxu1 }
 0x22c   :  { %v2353_v25 = vadd.f32 %v2352_v12, %v2340_v10 }
 0x22e   :  { %v2366_v5 = vadd.f32 %v2365_v31, %v2353_v25 }
 0x22f   :  { %v2430_v61 = vpop.f32.mrf.mxu3 }
 0x230   :  { %v2379_v33 = vadd.f32 %v2378_v24, %v2366_v5 }
 0x231   :  { %v2341_v26 = vpop.f32.mrf.mxu0 }
 0x232   :  { %2701 = vmatpush.bf16.xpose.msra.mxu0 %v1164_v50  ;;  %2714 = vmatpush.bf16.xpose.msra.mxu1 %v1165_v43 }
 0x233   :  { %v2367_v27 = vpop.f32.mrf.mxu2  ;;  %v2406_v63 = vpop.f32.mrf.mxu1 }
 0x237   :  { %v2432_v42 = vpop.f32.mrf.mxu3 }
 0x239   :  { %2702 = vmatmul.bf16.vlgmr.msra.gmra.mxu0 %v1458_v11  ;;  %2715 = vmatmul.bf16.vlgmr.msra.gmra.mxu1 %v1459_v9  ;;  %v2391_v58 = vpop.f32.mrf.mxu0 }
 0x23a   :  { %v2392_v8 = vadd.f32 %v2391_v58, %v2379_v33 }
 0x23b   :  { %v2417_v60 = vpop.f32.mrf.mxu2 }
 0x23c   :  { %v2405_v13 = vadd.f32 %v2404_v59, %v2392_v8 }
 0x23e   :  { %v2456_v47 = vpop.f32.mrf.mxu1  ;;  %v2418_v14 = vadd.f32 %v2417_v60, %v2405_v13 }
 0x240   :  { %v2431_v32 = vadd.f32 %v2430_v61, %v2418_v14 }
 0x241   :  { %v2393_v62 = vpop.f32.mrf.mxu0 }
 0x243   :  { %v2419_v0 = vpop.f32.mrf.mxu2 }
 0x246   :  { %v2458_v40 = vpop.f32.mrf.mxu1 }
 0x247   :  { %v2482_v1 = vpop.f32.mrf.mxu3  ;;  %v2756_v40 = vld [vmem:[%s3015_s3] ss:$0 sm:$0xff] }
 0x249   :  { %v2443_v57 = vpop.f32.mrf.mxu0 }
 0x24a   :  { %v2444_v36 = vadd.f32 %v2443_v57, %v2431_v32 }
 0x24b   :  { %v2469_v48 = vpop.f32.mrf.mxu2 }
 0x24c   :  { %v2457_v38 = vadd.f32 %v2456_v47, %v2444_v36 }
 0x24e   :  { %v2470_v39 = vadd.f32 %v2469_v48, %v2457_v38 }
 0x24f   :  { %v2484_v4 = vpop.f32.mrf.mxu3 }
 0x250   :  { %v2483_v41 = vadd.f32 %v2482_v1, %v2470_v39  ;;  %v2755_v1 = vld [vmem:[%s3014_s2] ss:$0 sm:$0xff] }
 0x251   :  { %v2445_v2 = vpop.f32.mrf.mxu0 }
 0x253   :  { %v2471_v3 = vpop.f32.mrf.mxu2 }
 0x256   :  { %v2508_v7 = vpop.f32.mrf.mxu1 }
 0x259   :  { %v2495_v6 = vpop.f32.mrf.mxu0 }
 0x25a   :  { %v2496_v44 = vadd.f32 %v2495_v6, %v2483_v41 }
 0x25c   :  { %v2509_v21 = vadd.f32 %v2508_v7, %v2496_v44 }
 0x25e   :  { %v2510_v18 = vpop.f32.mrf.mxu1 }
 0x25f   :  { %v2521_v15 = vpop.f32.mrf.mxu2  ;;  %v2534_v16 = vpop.f32.mrf.mxu3 }
 0x260   :  { %v2522_v53 = vadd.f32 %v2521_v15, %v2509_v21 }
 0x261   :  { %v2497_v19 = vpop.f32.mrf.mxu0 }
 0x262   :  { %v2535_v43 = vadd.f32 %v2534_v16, %v2522_v53 }
 0x267   :  { %v2523_v37 = vpop.f32.mrf.mxu2  ;;  %v2536_v29 = vpop.f32.mrf.mxu3 }
 0x26e   :  { %v2547_v34 = vpop.f32.mrf.mxu0  ;;  %v2560_v28 = vpop.f32.mrf.mxu1 }
 0x26f   :  { %v2548_v22 = vadd.f32 %v2547_v34, %v2535_v43 }
 0x271   :  { %v2561_v35 = vadd.f32 %v2560_v28, %v2548_v22 }
 0x276   :  { %v2549_v51 = vpop.f32.mrf.mxu0  ;;  %v2562_v52 = vpop.f32.mrf.mxu1 }
 0x277   :  { %v2573_v45 = vpop.f32.mrf.mxu2  ;;  %v2586_v46 = vpop.f32.mrf.mxu3 }
 0x278   :  { %v2574_v30 = vadd.f32 %v2573_v45, %v2561_v35 }
 0x27a   :  { %v2587_v12 = vadd.f32 %v2586_v46, %v2574_v30 }
 0x27f   :  { %v2575_v23 = vpop.f32.mrf.mxu2  ;;  %v2588_v50 = vpop.f32.mrf.mxu3 }
 0x286   :  { %v2599_v54 = vpop.f32.mrf.mxu0  ;;  %v2612_v20 = vpop.f32.mrf.mxu1 }
 0x287   :  { %v2600_v10 = vadd.f32 %v2599_v54, %v2587_v12 }
 0x289   :  { %v2613_v24 = vadd.f32 %v2612_v20, %v2600_v10 }
 0x28e   :  { %v2601_v9 = vpop.f32.mrf.mxu0  ;;  %v2614_v49 = vpop.f32.mrf.mxu1 }
 0x28f   :  { %v2625_v17 = vpop.f32.mrf.mxu2  ;;  %v2638_v11 = vpop.f32.mrf.mxu3 }
 0x290   :  { %v2626_v55 = vadd.f32 %v2625_v17, %v2613_v24 }
 0x292   :  { %v2639_v33 = vadd.f32 %v2638_v11, %v2626_v55 }
 0x297   :  { %v2627_v25 = vpop.f32.mrf.mxu2  ;;  %v2640_v31 = vpop.f32.mrf.mxu3 }
 0x29e   :  { %v2651_v5 = vpop.f32.mrf.mxu0  ;;  %v2664_v26 = vpop.f32.mrf.mxu1 }
 0x29f   :  { %v2652_v27 = vadd.f32 %v2651_v5, %v2639_v33 }
 0x2a1   :  { %v2665_v61 = vadd.f32 %v2664_v26, %v2652_v27 }
 0x2a6   :  { %v2677_v56 = vpop.f32.mrf.mxu2  ;;  %v2690_v58 = vpop.f32.mrf.mxu3 }
 0x2a7   :  { %v2653_v59 = vpop.f32.mrf.mxu0  ;;  %v2666_v60 = vpop.f32.mrf.mxu1  ;;  %v2678_v62 = vadd.f32 %v2677_v56, %v2665_v61 }
 0x2a9   :  { %v2691_v42 = vadd.f32 %v2690_v58, %v2678_v62 }
 0x2ae   :  { %v2679_v63 = vpop.f32.mrf.mxu2  ;;  %v2692_v0 = vpop.f32.mrf.mxu3 }
 0x2b6   :  { %v2703_v57 = vpop.f32.mrf.mxu0  ;;  %v2716_v47 = vpop.f32.mrf.mxu1 }
 0x2b7   :  { %v2704_v48 = vadd.f32 %v2703_v57, %v2691_v42 }
 0x2b9   :  { %v2717_v2 = vadd.f32 %v2716_v47, %v2704_v48 }
 0x2bb   :  { %v2724_v3 = vmul.f32 %v2755_v1, %v2717_v2 }
 0x2bd   :  { %v2729_v4 = vadd.f32 %v2756_v40, %v2724_v3 }
 0x2be   :  { %v2705_v6 = vpop.f32.mrf.mxu0  ;;  %v2718_v7 = vpop.f32.mrf.mxu1 }
 0x2bf   :  { %2731 = vst.msk [vmem:[#allocation7] sm:$0x3] %vm2730_vm0, %v2729_v4 }
 0x2c0   :  { %2742 = dma.vmem_to_hbm [thread:$0]  %s2738_s30, 32, %s2740_s7, [#allocation4]  }
 0x2c1   :  { %2833 = dma.done.wait [#allocation4], 32  }
 0x2c2   :  { %2834 = vsyncadd [#allocation4], 4294967264 }
 0x2c3   :  { %2747 = vsyncpa [#allocation3], 1 }
 0x2c4   :  { %2748 = vsyncpa [#allocation6], 1 }
 0x2c5   :  { %2749 = vsyncpa [#allocation4], 1 }

</bundles_post_ra>
